<compile_context>
chip_gen: v7x
topology: tpu7x:2x2x1
jax: 0.10.0
libtpu: 0.0.40
codegen_flags: <defaults>
</compile_context>

<pallas_src>
import functools
import math

import jax
import jax.numpy as jnp
from jax.experimental import pallas as pl
from jax.experimental.pallas import tpu as pltpu


def mha_kernel(q_in_ref, k_in_ref, v_in_ref,
               wq_ref, wk_ref, wv_ref, wo_ref,
               g_ref, b_ref,
               out_ref, attn_ref,
               *, n_heads, d_k, d_v, scale, eps):
    """One batch element per grid step; all heads processed in-kernel."""
    f32 = jnp.float32

    xq = q_in_ref[0]                       # (S, d_model)
    xk = k_in_ref[0]
    xv = v_in_ref[0]                       # residual source

    # QKV projections on the MXU (x @ W, weights stored (d_model, H*d)).
    Q = jnp.dot(xq, wq_ref[...], preferred_element_type=f32)   # (S, H*d_k)
    K = jnp.dot(xk, wk_ref[...], preferred_element_type=f32)   # (S, H*d_k)
    V = jnp.dot(xv, wv_ref[...], preferred_element_type=f32)   # (S, H*d_v)

    S = Q.shape[0]
    d_model = out_ref.shape[-1]

    # Output projection accumulated per head (avoids lane-axis concat).
    acc = jnp.zeros((S, d_model), dtype=f32)
    for h in range(n_heads):               # static unroll, n_heads is small
        qh = Q[:, h * d_k:(h + 1) * d_k]   # (S, d_k)
        kh = K[:, h * d_k:(h + 1) * d_k]   # (S, d_k)
        vh = V[:, h * d_v:(h + 1) * d_v]   # (S, d_v)

        s = jnp.dot(qh, kh.T, preferred_element_type=f32) * scale      # (S, S)
        s = s - jnp.max(s, axis=-1, keepdims=True)
        p = jnp.exp(s)
        p = p / jnp.sum(p, axis=-1, keepdims=True)                     # softmax
        attn_ref[0, h, :, :] = p.astype(attn_ref.dtype)

        ctx = jnp.dot(p, vh, preferred_element_type=f32)               # (S, d_v)
        acc = acc + jnp.dot(ctx, wo_ref[h * d_v:(h + 1) * d_v, :],
                            preferred_element_type=f32)                # (S, d_model)

    # Residual (input_V) + LayerNorm over d_model, eps = 1e-5.
    y = acc + xv.astype(f32)
    mean = jnp.mean(y, axis=-1, keepdims=True)
    cent = y - mean
    var = jnp.mean(cent * cent, axis=-1, keepdims=True)
    norm = cent * jax.lax.rsqrt(var + eps)
    out = norm * g_ref[...] + b_ref[...]                               # (1,d_model) broadcast

    out_ref[0] = out.astype(out_ref.dtype)


def multi_attention_forward(input_Q, input_K, input_V,
                            w_q, w_k, w_v, w_o, gamma, beta,
                            *, n_heads, d_k, d_v, eps=1e-5):
    """input_*: (B, S, d_model). Weights stored (in, out). Returns (out, attn)."""
    B, S, d_model = input_Q.shape
    assert w_q.shape == (d_model, n_heads * d_k)
    assert w_o.shape == (n_heads * d_v, d_model)
    scale = 1.0 / math.sqrt(d_k)

    g2 = gamma.reshape(1, d_model)
    b2 = beta.reshape(1, d_model)

    kernel = functools.partial(mha_kernel, n_heads=n_heads, d_k=d_k, d_v=d_v,
                               scale=scale, eps=eps)

    out, attn = pl.pallas_call(
        kernel,
        out_shape=(
            jax.ShapeDtypeStruct((B, S, d_model), input_V.dtype),
            jax.ShapeDtypeStruct((B, n_heads, S, S), jnp.float32),
        ),
        grid_spec=pltpu.PrefetchScalarGridSpec(
            num_scalar_prefetch=0,
            grid=(B,),
            in_specs=[
                pl.BlockSpec((1, S, d_model), lambda b: (b, 0, 0)),          # input_Q
                pl.BlockSpec((1, S, d_model), lambda b: (b, 0, 0)),          # input_K
                pl.BlockSpec((1, S, d_model), lambda b: (b, 0, 0)),          # input_V
                pl.BlockSpec((d_model, n_heads * d_k), lambda b: (0, 0)),    # W_Q (grid-invariant)
                pl.BlockSpec((d_model, n_heads * d_k), lambda b: (0, 0)),    # W_K
                pl.BlockSpec((d_model, n_heads * d_v), lambda b: (0, 0)),    # W_V
                pl.BlockSpec((n_heads * d_v, d_model), lambda b: (0, 0)),    # W_fc
                pl.BlockSpec((1, d_model), lambda b: (0, 0)),                # gamma
                pl.BlockSpec((1, d_model), lambda b: (0, 0)),                # beta
            ],
            out_specs=[
                pl.BlockSpec((1, S, d_model), lambda b: (b, 0, 0)),          # out
                pl.BlockSpec((1, n_heads, S, S), lambda b: (b, 0, 0, 0)),    # attn
            ],
        ),
        compiler_params=pltpu.CompilerParams(
            dimension_semantics=("parallel",),
            vmem_limit_bytes=64 * 1024 * 1024,
        ),
    )(input_Q, input_K, input_V, w_q, w_k, w_v, w_o, g2, b2)

    return out, attn


def multi_attention_reference(input_Q, input_K, input_V,
                              w_q, w_k, w_v, w_o, gamma, beta,
                              *, n_heads, d_k, d_v, eps=1e-5):
    B, S, d_model = input_Q.shape
    Q = (input_Q @ w_q).reshape(B, S, n_heads, d_k).transpose(0, 2, 1, 3)
    K = (input_K @ w_k).reshape(B, S, n_heads, d_k).transpose(0, 2, 1, 3)
    V = (input_V @ w_v).reshape(B, S, n_heads, d_v).transpose(0, 2, 1, 3)
    scores = jnp.einsum('bhqd,bhkd->bhqk', Q, K) / jnp.sqrt(jnp.float32(d_k))
    attn = jax.nn.softmax(scores, axis=-1)
    ctx = jnp.einsum('bhqk,bhkd->bhqd', attn, V)
    ctx = ctx.transpose(0, 2, 1, 3).reshape(B, S, n_heads * d_v)
    y = ctx @ w_o + input_V
    mean = jnp.mean(y, axis=-1, keepdims=True)
    var = jnp.mean((y - mean) ** 2, axis=-1, keepdims=True)
    out = (y - mean) * jax.lax.rsqrt(var + eps)
    return out * gamma + beta, attn


if __name__ == "__main__":
    # Small shapes consistent with the module; d_model=128 keeps the stored
    # output lane-dense and the MXU contraction >= 128.
    B, S, d_model = 2, 16, 128
    n_heads, d_k, d_v = 4, 32, 32

    key = jax.random.PRNGKey(0)
    kq, kk, kv, k1, k2, k3, k4 = jax.random.split(key, 7)

    input_Q = jax.random.normal(kq, (B, S, d_model), dtype=jnp.float32)
    input_K = jax.random.normal(kk, (B, S, d_model), dtype=jnp.float32)
    input_V = jax.random.normal(kv, (B, S, d_model), dtype=jnp.float32)

    # nn.Linear(in, out, bias=False) weights, stored transposed (in, out) for x @ W.
    w_q = jax.random.normal(k1, (d_model, n_heads * d_k), jnp.float32) / math.sqrt(d_model)
    w_k = jax.random.normal(k2, (d_model, n_heads * d_k), jnp.float32) / math.sqrt(d_model)
    w_v = jax.random.normal(k3, (d_model, n_heads * d_v), jnp.float32) / math.sqrt(d_model)
    w_o = jax.random.normal(k4, (n_heads * d_v, d_model), jnp.float32) / math.sqrt(n_heads * d_v)
    # nn.LayerNorm(d_model) defaults: weight=1, bias=0.
    gamma = jnp.ones((d_model,), dtype=jnp.float32)
    beta = jnp.zeros((d_model,), dtype=jnp.float32)

    out, attn = multi_attention_forward(
        input_Q, input_K, input_V, w_q, w_k, w_v, w_o, gamma, beta,
        n_heads=n_heads, d_k=d_k, d_v=d_v)
    out = jax.block_until_ready(out)
    attn = jax.block_until_ready(attn)

    ref_out, ref_attn = multi_attention_reference(
        input_Q, input_K, input_V, w_q, w_k, w_v, w_o, gamma, beta,
        n_heads=n_heads, d_k=d_k, d_v=d_v)

    assert out.shape == (B, S, d_model)
    assert attn.shape == (B, n_heads, S, S)
    assert jnp.allclose(out, ref_out, atol=1e-4, rtol=1e-4)
    assert jnp.allclose(attn, ref_attn, atol=1e-5, rtol=1e-5)

    print("KERNEL_OK")
</pallas_src>

<mosaic_0001>
module attributes {stable_mosaic.version = 11 : i64} {
  func.func @mha_kernel(%arg0: i32, %arg1: memref<1x16x128xf32, #tpu.memory_space<vmem>>, %arg2: memref<1x16x128xf32, #tpu.memory_space<vmem>>, %arg3: memref<1x16x128xf32, #tpu.memory_space<vmem>>, %arg4: memref<128x128xf32, #tpu.memory_space<vmem>>, %arg5: memref<128x128xf32, #tpu.memory_space<vmem>>, %arg6: memref<128x128xf32, #tpu.memory_space<vmem>>, %arg7: memref<128x128xf32, #tpu.memory_space<vmem>>, %arg8: memref<1x128xf32, #tpu.memory_space<vmem>>, %arg9: memref<1x128xf32, #tpu.memory_space<vmem>>, %arg10: memref<1x16x128xf32, #tpu.memory_space<vmem>>, %arg11: memref<1x4x16x16xf32, #tpu.memory_space<vmem>>) attributes {dimension_semantics = [#tpu.dimension_semantics<parallel>], iteration_bounds = array<i64: 2>, scalar_prefetch = 0 : i64, scratch_operands = 0 : i64, tpu.core_type = #tpu.core_type<tc>, window_params = [{transform_indices = @transform_0, window_bounds = array<i64: 1, 16, 128>}, {transform_indices = @transform_1, window_bounds = array<i64: 1, 16, 128>}, {transform_indices = @transform_2, window_bounds = array<i64: 1, 16, 128>}, {pipeline_mode = #tpu.pipeline_mode<synchronous>, transform_indices = @transform_3, window_bounds = array<i64: 128, 128>}, {pipeline_mode = #tpu.pipeline_mode<synchronous>, transform_indices = @transform_4, window_bounds = array<i64: 128, 128>}, {pipeline_mode = #tpu.pipeline_mode<synchronous>, transform_indices = @transform_5, window_bounds = array<i64: 128, 128>}, {pipeline_mode = #tpu.pipeline_mode<synchronous>, transform_indices = @transform_6, window_bounds = array<i64: 128, 128>}, {pipeline_mode = #tpu.pipeline_mode<synchronous>, transform_indices = @transform_7, window_bounds = array<i64: 1, 128>}, {pipeline_mode = #tpu.pipeline_mode<synchronous>, transform_indices = @transform_8, window_bounds = array<i64: 1, 128>}, {transform_indices = @transform_9, window_bounds = array<i64: 1, 16, 128>}, {transform_indices = @transform_10, window_bounds = array<i64: 1, 4, 16, 16>}]} {
    %c0 = arith.constant 0 : index
    %c0_0 = arith.constant 0 : index
    %c0_1 = arith.constant 0 : index
    %0 = vector.load %arg1[%c0, %c0_0, %c0_1] : memref<1x16x128xf32, #tpu.memory_space<vmem>>, vector<1x16x128xf32>
    %1 = vector.shape_cast %0 : vector<1x16x128xf32> to vector<16x128xf32>
    %c0_2 = arith.constant 0 : index
    %c0_3 = arith.constant 0 : index
    %c0_4 = arith.constant 0 : index
    %2 = vector.load %arg2[%c0_2, %c0_3, %c0_4] : memref<1x16x128xf32, #tpu.memory_space<vmem>>, vector<1x16x128xf32>
    %3 = vector.shape_cast %2 : vector<1x16x128xf32> to vector<16x128xf32>
    %c0_5 = arith.constant 0 : index
    %c0_6 = arith.constant 0 : index
    %c0_7 = arith.constant 0 : index
    %4 = vector.load %arg3[%c0_5, %c0_6, %c0_7] : memref<1x16x128xf32, #tpu.memory_space<vmem>>, vector<1x16x128xf32>
    %5 = vector.shape_cast %4 : vector<1x16x128xf32> to vector<16x128xf32>
    %c0_8 = arith.constant 0 : index
    %c0_9 = arith.constant 0 : index
    %6 = vector.load %arg4[%c0_8, %c0_9] : memref<128x128xf32, #tpu.memory_space<vmem>>, vector<128x128xf32>
    %cst = arith.constant dense<0.000000e+00> : vector<16x128xf32>
    %7 = tpu.matmul %1, %6, %cst {dimension_numbers = #tpu.dot_dimension_numbers<[1], [0], [0], [1], [0, 0, 1, 1], [], []>} : vector<16x128xf32>, vector<128x128xf32>, vector<16x128xf32> -> vector<16x128xf32>
    %c0_10 = arith.constant 0 : index
    %c0_11 = arith.constant 0 : index
    %8 = vector.load %arg5[%c0_10, %c0_11] : memref<128x128xf32, #tpu.memory_space<vmem>>, vector<128x128xf32>
    %cst_12 = arith.constant dense<0.000000e+00> : vector<16x128xf32>
    %9 = tpu.matmul %3, %8, %cst_12 {dimension_numbers = #tpu.dot_dimension_numbers<[1], [0], [0], [1], [0, 0, 1, 1], [], []>} : vector<16x128xf32>, vector<128x128xf32>, vector<16x128xf32> -> vector<16x128xf32>
    %c0_13 = arith.constant 0 : index
    %c0_14 = arith.constant 0 : index
    %10 = vector.load %arg6[%c0_13, %c0_14] : memref<128x128xf32, #tpu.memory_space<vmem>>, vector<128x128xf32>
    %cst_15 = arith.constant dense<0.000000e+00> : vector<16x128xf32>
    %11 = tpu.matmul %5, %10, %cst_15 {dimension_numbers = #tpu.dot_dimension_numbers<[1], [0], [0], [1], [0, 0, 1, 1], [], []>} : vector<16x128xf32>, vector<128x128xf32>, vector<16x128xf32> -> vector<16x128xf32>
    %cst_16 = arith.constant 0.000000e+00 : f32
    %12 = vector.broadcast %cst_16 : f32 to vector<16x128xf32>
    %13 = vector.extract_strided_slice %7 {offsets = [0, 0], sizes = [16, 32], strides = [1, 1]} : vector<16x128xf32> to vector<16x32xf32>
    %14 = vector.extract_strided_slice %9 {offsets = [0, 0], sizes = [16, 32], strides = [1, 1]} : vector<16x128xf32> to vector<16x32xf32>
    %15 = vector.extract_strided_slice %11 {offsets = [0, 0], sizes = [16, 32], strides = [1, 1]} : vector<16x128xf32> to vector<16x32xf32>
    %16 = tpu.transpose %14, [1, 0] : vector<16x32xf32> -> vector<32x16xf32>
    %cst_17 = arith.constant dense<0.000000e+00> : vector<16x16xf32>
    %17 = tpu.matmul %13, %16, %cst_17 {dimension_numbers = #tpu.dot_dimension_numbers<[1], [0], [0], [1], [0, 0, 1, 1], [], []>} : vector<16x32xf32>, vector<32x16xf32>, vector<16x16xf32> -> vector<16x16xf32>
    %cst_18 = arith.constant 0.176776692 : f32
    %18 = vector.broadcast %cst_18 : f32 to vector<16x16xf32>
    %19 = arith.mulf %17, %18 : vector<16x16xf32>
    %cst_19 = arith.constant dense<0xFF800000> : vector<16xf32>
    %20 = vector.multi_reduction <maximumf>, %19, %cst_19 [1] : vector<16x16xf32> to vector<16xf32>
    %21 = vector.shape_cast %20 : vector<16xf32> to vector<16x1xf32>
    %22 = vector.broadcast %21 : vector<16x1xf32> to vector<16x16xf32>
    %23 = arith.subf %19, %22 : vector<16x16xf32>
    %24 = math.exp %23 : vector<16x16xf32>
    %cst_20 = arith.constant dense<0.000000e+00> : vector<16xf32>
    %25 = vector.multi_reduction <add>, %24, %cst_20 [1] : vector<16x16xf32> to vector<16xf32>
    %26 = vector.shape_cast %25 : vector<16xf32> to vector<16x1xf32>
    %27 = vector.broadcast %26 : vector<16x1xf32> to vector<16x16xf32>
    %28 = arith.divf %24, %27 : vector<16x16xf32>
    %c0_21 = arith.constant 0 : index
    %c0_22 = arith.constant 0 : index
    %c0_23 = arith.constant 0 : index
    %c0_24 = arith.constant 0 : index
    %29 = vector.load %arg11[%c0_21, %c0_22, %c0_23, %c0_24] : memref<1x4x16x16xf32, #tpu.memory_space<vmem>>, vector<1x1x16x16xf32>
    %30 = vector.shape_cast %29 : vector<1x1x16x16xf32> to vector<16x16xf32>
    %31 = vector.shape_cast %28 : vector<16x16xf32> to vector<1x1x16x16xf32>
    tpu.vector_store %arg11[%c0_21, %c0_22, %c0_23, %c0_24], %31 {strides = array<i32>} : memref<1x4x16x16xf32, #tpu.memory_space<vmem>>, vector<1x1x16x16xf32>,
    %cst_25 = arith.constant dense<0.000000e+00> : vector<16x32xf32>
    %32 = tpu.matmul %28, %15, %cst_25 {dimension_numbers = #tpu.dot_dimension_numbers<[1], [0], [0], [1], [0, 0, 1, 1], [], []>} : vector<16x16xf32>, vector<16x32xf32>, vector<16x32xf32> -> vector<16x32xf32>
    %c0_26 = arith.constant 0 : index
    %c0_27 = arith.constant 0 : index
    %33 = vector.load %arg7[%c0_26, %c0_27] : memref<128x128xf32, #tpu.memory_space<vmem>>, vector<32x128xf32>
    %cst_28 = arith.constant dense<0.000000e+00> : vector<16x128xf32>
    %34 = tpu.matmul %32, %33, %cst_28 {dimension_numbers = #tpu.dot_dimension_numbers<[1], [0], [0], [1], [0, 0, 1, 1], [], []>} : vector<16x32xf32>, vector<32x128xf32>, vector<16x128xf32> -> vector<16x128xf32>
    %35 = arith.addf %12, %34 : vector<16x128xf32>
    %36 = vector.extract_strided_slice %7 {offsets = [0, 32], sizes = [16, 32], strides = [1, 1]} : vector<16x128xf32> to vector<16x32xf32>
    %37 = vector.extract_strided_slice %9 {offsets = [0, 32], sizes = [16, 32], strides = [1, 1]} : vector<16x128xf32> to vector<16x32xf32>
    %38 = vector.extract_strided_slice %11 {offsets = [0, 32], sizes = [16, 32], strides = [1, 1]} : vector<16x128xf32> to vector<16x32xf32>
    %39 = tpu.transpose %37, [1, 0] : vector<16x32xf32> -> vector<32x16xf32>
    %cst_29 = arith.constant dense<0.000000e+00> : vector<16x16xf32>
    %40 = tpu.matmul %36, %39, %cst_29 {dimension_numbers = #tpu.dot_dimension_numbers<[1], [0], [0], [1], [0, 0, 1, 1], [], []>} : vector<16x32xf32>, vector<32x16xf32>, vector<16x16xf32> -> vector<16x16xf32>
    %cst_30 = arith.constant 0.176776692 : f32
    %41 = vector.broadcast %cst_30 : f32 to vector<16x16xf32>
    %42 = arith.mulf %40, %41 : vector<16x16xf32>
    %cst_31 = arith.constant dense<0xFF800000> : vector<16xf32>
    %43 = vector.multi_reduction <maximumf>, %42, %cst_31 [1] : vector<16x16xf32> to vector<16xf32>
    %44 = vector.shape_cast %43 : vector<16xf32> to vector<16x1xf32>
    %45 = vector.broadcast %44 : vector<16x1xf32> to vector<16x16xf32>
    %46 = arith.subf %42, %45 : vector<16x16xf32>
    %47 = math.exp %46 : vector<16x16xf32>
    %cst_32 = arith.constant dense<0.000000e+00> : vector<16xf32>
    %48 = vector.multi_reduction <add>, %47, %cst_32 [1] : vector<16x16xf32> to vector<16xf32>
    %49 = vector.shape_cast %48 : vector<16xf32> to vector<16x1xf32>
    %50 = vector.broadcast %49 : vector<16x1xf32> to vector<16x16xf32>
    %51 = arith.divf %47, %50 : vector<16x16xf32>
    %c0_33 = arith.constant 0 : index
    %c1 = arith.constant 1 : index
    %c0_34 = arith.constant 0 : index
    %c0_35 = arith.constant 0 : index
    %52 = vector.load %arg11[%c0_33, %c1, %c0_34, %c0_35] : memref<1x4x16x16xf32, #tpu.memory_space<vmem>>, vector<1x1x16x16xf32>
    %53 = vector.shape_cast %52 : vector<1x1x16x16xf32> to vector<16x16xf32>
    %54 = vector.shape_cast %51 : vector<16x16xf32> to vector<1x1x16x16xf32>
    tpu.vector_store %arg11[%c0_33, %c1, %c0_34, %c0_35], %54 {strides = array<i32>} : memref<1x4x16x16xf32, #tpu.memory_space<vmem>>, vector<1x1x16x16xf32>,
    %cst_36 = arith.constant dense<0.000000e+00> : vector<16x32xf32>
    %55 = tpu.matmul %51, %38, %cst_36 {dimension_numbers = #tpu.dot_dimension_numbers<[1], [0], [0], [1], [0, 0, 1, 1], [], []>} : vector<16x16xf32>, vector<16x32xf32>, vector<16x32xf32> -> vector<16x32xf32>
    %c32 = arith.constant 32 : index
    %c0_37 = arith.constant 0 : index
    %56 = vector.load %arg7[%c32, %c0_37] : memref<128x128xf32, #tpu.memory_space<vmem>>, vector<32x128xf32>
    %cst_38 = arith.constant dense<0.000000e+00> : vector<16x128xf32>
    %57 = tpu.matmul %55, %56, %cst_38 {dimension_numbers = #tpu.dot_dimension_numbers<[1], [0], [0], [1], [0, 0, 1, 1], [], []>} : vector<16x32xf32>, vector<32x128xf32>, vector<16x128xf32> -> vector<16x128xf32>
    %58 = arith.addf %35, %57 : vector<16x128xf32>
    %59 = vector.extract_strided_slice %7 {offsets = [0, 64], sizes = [16, 32], strides = [1, 1]} : vector<16x128xf32> to vector<16x32xf32>
    %60 = vector.extract_strided_slice %9 {offsets = [0, 64], sizes = [16, 32], strides = [1, 1]} : vector<16x128xf32> to vector<16x32xf32>
    %61 = vector.extract_strided_slice %11 {offsets = [0, 64], sizes = [16, 32], strides = [1, 1]} : vector<16x128xf32> to vector<16x32xf32>
    %62 = tpu.transpose %60, [1, 0] : vector<16x32xf32> -> vector<32x16xf32>
    %cst_39 = arith.constant dense<0.000000e+00> : vector<16x16xf32>
    %63 = tpu.matmul %59, %62, %cst_39 {dimension_numbers = #tpu.dot_dimension_numbers<[1], [0], [0], [1], [0, 0, 1, 1], [], []>} : vector<16x32xf32>, vector<32x16xf32>, vector<16x16xf32> -> vector<16x16xf32>
    %cst_40 = arith.constant 0.176776692 : f32
    %64 = vector.broadcast %cst_40 : f32 to vector<16x16xf32>
    %65 = arith.mulf %63, %64 : vector<16x16xf32>
    %cst_41 = arith.constant dense<0xFF800000> : vector<16xf32>
    %66 = vector.multi_reduction <maximumf>, %65, %cst_41 [1] : vector<16x16xf32> to vector<16xf32>
    %67 = vector.shape_cast %66 : vector<16xf32> to vector<16x1xf32>
    %68 = vector.broadcast %67 : vector<16x1xf32> to vector<16x16xf32>
    %69 = arith.subf %65, %68 : vector<16x16xf32>
    %70 = math.exp %69 : vector<16x16xf32>
    %cst_42 = arith.constant dense<0.000000e+00> : vector<16xf32>
    %71 = vector.multi_reduction <add>, %70, %cst_42 [1] : vector<16x16xf32> to vector<16xf32>
    %72 = vector.shape_cast %71 : vector<16xf32> to vector<16x1xf32>
    %73 = vector.broadcast %72 : vector<16x1xf32> to vector<16x16xf32>
    %74 = arith.divf %70, %73 : vector<16x16xf32>
    %c0_43 = arith.constant 0 : index
    %c2 = arith.constant 2 : index
    %c0_44 = arith.constant 0 : index
    %c0_45 = arith.constant 0 : index
    %75 = vector.load %arg11[%c0_43, %c2, %c0_44, %c0_45] : memref<1x4x16x16xf32, #tpu.memory_space<vmem>>, vector<1x1x16x16xf32>
    %76 = vector.shape_cast %75 : vector<1x1x16x16xf32> to vector<16x16xf32>
    %77 = vector.shape_cast %74 : vector<16x16xf32> to vector<1x1x16x16xf32>
    tpu.vector_store %arg11[%c0_43, %c2, %c0_44, %c0_45], %77 {strides = array<i32>} : memref<1x4x16x16xf32, #tpu.memory_space<vmem>>, vector<1x1x16x16xf32>,
    %cst_46 = arith.constant dense<0.000000e+00> : vector<16x32xf32>
    %78 = tpu.matmul %74, %61, %cst_46 {dimension_numbers = #tpu.dot_dimension_numbers<[1], [0], [0], [1], [0, 0, 1, 1], [], []>} : vector<16x16xf32>, vector<16x32xf32>, vector<16x32xf32> -> vector<16x32xf32>
    %c64 = arith.constant 64 : index
    %c0_47 = arith.constant 0 : index
    %79 = vector.load %arg7[%c64, %c0_47] : memref<128x128xf32, #tpu.memory_space<vmem>>, vector<32x128xf32>
    %cst_48 = arith.constant dense<0.000000e+00> : vector<16x128xf32>
    %80 = tpu.matmul %78, %79, %cst_48 {dimension_numbers = #tpu.dot_dimension_numbers<[1], [0], [0], [1], [0, 0, 1, 1], [], []>} : vector<16x32xf32>, vector<32x128xf32>, vector<16x128xf32> -> vector<16x128xf32>
    %81 = arith.addf %58, %80 : vector<16x128xf32>
    %82 = vector.extract_strided_slice %7 {offsets = [0, 96], sizes = [16, 32], strides = [1, 1]} : vector<16x128xf32> to vector<16x32xf32>
    %83 = vector.extract_strided_slice %9 {offsets = [0, 96], sizes = [16, 32], strides = [1, 1]} : vector<16x128xf32> to vector<16x32xf32>
    %84 = vector.extract_strided_slice %11 {offsets = [0, 96], sizes = [16, 32], strides = [1, 1]} : vector<16x128xf32> to vector<16x32xf32>
    %85 = tpu.transpose %83, [1, 0] : vector<16x32xf32> -> vector<32x16xf32>
    %cst_49 = arith.constant dense<0.000000e+00> : vector<16x16xf32>
    %86 = tpu.matmul %82, %85, %cst_49 {dimension_numbers = #tpu.dot_dimension_numbers<[1], [0], [0], [1], [0, 0, 1, 1], [], []>} : vector<16x32xf32>, vector<32x16xf32>, vector<16x16xf32> -> vector<16x16xf32>
    %cst_50 = arith.constant 0.176776692 : f32
    %87 = vector.broadcast %cst_50 : f32 to vector<16x16xf32>
    %88 = arith.mulf %86, %87 : vector<16x16xf32>
    %cst_51 = arith.constant dense<0xFF800000> : vector<16xf32>
    %89 = vector.multi_reduction <maximumf>, %88, %cst_51 [1] : vector<16x16xf32> to vector<16xf32>
    %90 = vector.shape_cast %89 : vector<16xf32> to vector<16x1xf32>
    %91 = vector.broadcast %90 : vector<16x1xf32> to vector<16x16xf32>
    %92 = arith.subf %88, %91 : vector<16x16xf32>
    %93 = math.exp %92 : vector<16x16xf32>
    %cst_52 = arith.constant dense<0.000000e+00> : vector<16xf32>
    %94 = vector.multi_reduction <add>, %93, %cst_52 [1] : vector<16x16xf32> to vector<16xf32>
    %95 = vector.shape_cast %94 : vector<16xf32> to vector<16x1xf32>
    %96 = vector.broadcast %95 : vector<16x1xf32> to vector<16x16xf32>
    %97 = arith.divf %93, %96 : vector<16x16xf32>
    %c0_53 = arith.constant 0 : index
    %c3 = arith.constant 3 : index
    %c0_54 = arith.constant 0 : index
    %c0_55 = arith.constant 0 : index
    %98 = vector.load %arg11[%c0_53, %c3, %c0_54, %c0_55] : memref<1x4x16x16xf32, #tpu.memory_space<vmem>>, vector<1x1x16x16xf32>
    %99 = vector.shape_cast %98 : vector<1x1x16x16xf32> to vector<16x16xf32>
    %100 = vector.shape_cast %97 : vector<16x16xf32> to vector<1x1x16x16xf32>
    tpu.vector_store %arg11[%c0_53, %c3, %c0_54, %c0_55], %100 {strides = array<i32>} : memref<1x4x16x16xf32, #tpu.memory_space<vmem>>, vector<1x1x16x16xf32>,
    %cst_56 = arith.constant dense<0.000000e+00> : vector<16x32xf32>
    %101 = tpu.matmul %97, %84, %cst_56 {dimension_numbers = #tpu.dot_dimension_numbers<[1], [0], [0], [1], [0, 0, 1, 1], [], []>} : vector<16x16xf32>, vector<16x32xf32>, vector<16x32xf32> -> vector<16x32xf32>
    %c96 = arith.constant 96 : index
    %c0_57 = arith.constant 0 : index
    %102 = vector.load %arg7[%c96, %c0_57] : memref<128x128xf32, #tpu.memory_space<vmem>>, vector<32x128xf32>
    %cst_58 = arith.constant dense<0.000000e+00> : vector<16x128xf32>
    %103 = tpu.matmul %101, %102, %cst_58 {dimension_numbers = #tpu.dot_dimension_numbers<[1], [0], [0], [1], [0, 0, 1, 1], [], []>} : vector<16x32xf32>, vector<32x128xf32>, vector<16x128xf32> -> vector<16x128xf32>
    %104 = arith.addf %81, %103 : vector<16x128xf32>
    %105 = arith.addf %104, %5 : vector<16x128xf32>
    %cst_59 = arith.constant dense<0.000000e+00> : vector<16xf32>
    %106 = vector.multi_reduction <add>, %105, %cst_59 [1] : vector<16x128xf32> to vector<16xf32>
    %107 = vector.shape_cast %106 : vector<16xf32> to vector<16x1xf32>
    %cst_60 = arith.constant 1.280000e+02 : f32
    %108 = vector.broadcast %cst_60 : f32 to vector<16x1xf32>
    %109 = arith.divf %107, %108 : vector<16x1xf32>
    %110 = vector.broadcast %109 : vector<16x1xf32> to vector<16x128xf32>
    %111 = arith.subf %105, %110 : vector<16x128xf32>
    %112 = arith.mulf %111, %111 : vector<16x128xf32>
    %cst_61 = arith.constant dense<0.000000e+00> : vector<16xf32>
    %113 = vector.multi_reduction <add>, %112, %cst_61 [1] : vector<16x128xf32> to vector<16xf32>
    %114 = vector.shape_cast %113 : vector<16xf32> to vector<16x1xf32>
    %cst_62 = arith.constant 1.280000e+02 : f32
    %115 = vector.broadcast %cst_62 : f32 to vector<16x1xf32>
    %116 = arith.divf %114, %115 : vector<16x1xf32>
    %cst_63 = arith.constant 9.99999974E-6 : f32
    %117 = vector.broadcast %cst_63 : f32 to vector<16x1xf32>
    %118 = arith.addf %116, %117 : vector<16x1xf32>
    %119 = math.rsqrt %118 : vector<16x1xf32>
    %120 = vector.broadcast %119 : vector<16x1xf32> to vector<16x128xf32>
    %121 = arith.mulf %111, %120 : vector<16x128xf32>
    %c0_64 = arith.constant 0 : index
    %c0_65 = arith.constant 0 : index
    %122 = vector.load %arg8[%c0_64, %c0_65] : memref<1x128xf32, #tpu.memory_space<vmem>>, vector<1x128xf32>
    %123 = vector.broadcast %122 : vector<1x128xf32> to vector<16x128xf32>
    %124 = arith.mulf %121, %123 : vector<16x128xf32>
    %c0_66 = arith.constant 0 : index
    %c0_67 = arith.constant 0 : index
    %125 = vector.load %arg9[%c0_66, %c0_67] : memref<1x128xf32, #tpu.memory_space<vmem>>, vector<1x128xf32>
    %126 = vector.broadcast %125 : vector<1x128xf32> to vector<16x128xf32>
    %127 = arith.addf %124, %126 : vector<16x128xf32>
    %c0_68 = arith.constant 0 : index
    %c0_69 = arith.constant 0 : index
    %c0_70 = arith.constant 0 : index
    %128 = vector.load %arg10[%c0_68, %c0_69, %c0_70] : memref<1x16x128xf32, #tpu.memory_space<vmem>>, vector<1x16x128xf32>
    %129 = vector.shape_cast %128 : vector<1x16x128xf32> to vector<16x128xf32>
    %130 = vector.shape_cast %127 : vector<16x128xf32> to vector<1x16x128xf32>
    tpu.vector_store %arg10[%c0_68, %c0_69, %c0_70], %130 {strides = array<i32>} : memref<1x16x128xf32, #tpu.memory_space<vmem>>, vector<1x16x128xf32>,
    return
  }
  func.func @transform_0(%arg0: i32) -> (i32, i32, i32) {
    %c0_i32 = arith.constant 0 : i32
    %c0_i32_0 = arith.constant 0 : i32
    %c0_i32_1 = arith.constant 0 : i32
    return %arg0, %c0_i32, %c0_i32_0 : i32, i32, i32
  }
  func.func @transform_1(%arg0: i32) -> (i32, i32, i32) {
    %c0_i32 = arith.constant 0 : i32
    %c0_i32_0 = arith.constant 0 : i32
    %c0_i32_1 = arith.constant 0 : i32
    return %arg0, %c0_i32, %c0_i32_0 : i32, i32, i32
  }
  func.func @transform_2(%arg0: i32) -> (i32, i32, i32) {
    %c0_i32 = arith.constant 0 : i32
    %c0_i32_0 = arith.constant 0 : i32
    %c0_i32_1 = arith.constant 0 : i32
    return %arg0, %c0_i32, %c0_i32_0 : i32, i32, i32
  }
  func.func @transform_3(%arg0: i32) -> (i32, i32) {
    %c0_i32 = arith.constant 0 : i32
    %c0_i32_0 = arith.constant 0 : i32
    %c0_i32_1 = arith.constant 0 : i32
    return %c0_i32, %c0_i32_0 : i32, i32
  }
  func.func @transform_4(%arg0: i32) -> (i32, i32) {
    %c0_i32 = arith.constant 0 : i32
    %c0_i32_0 = arith.constant 0 : i32
    %c0_i32_1 = arith.constant 0 : i32
    return %c0_i32, %c0_i32_0 : i32, i32
  }
  func.func @transform_5(%arg0: i32) -> (i32, i32) {
    %c0_i32 = arith.constant 0 : i32
    %c0_i32_0 = arith.constant 0 : i32
    %c0_i32_1 = arith.constant 0 : i32
    return %c0_i32, %c0_i32_0 : i32, i32
  }
  func.func @transform_6(%arg0: i32) -> (i32, i32) {
    %c0_i32 = arith.constant 0 : i32
    %c0_i32_0 = arith.constant 0 : i32
    %c0_i32_1 = arith.constant 0 : i32
    return %c0_i32, %c0_i32_0 : i32, i32
  }
  func.func @transform_7(%arg0: i32) -> (i32, i32) {
    %c0_i32 = arith.constant 0 : i32
    %c0_i32_0 = arith.constant 0 : i32
    %c0_i32_1 = arith.constant 0 : i32
    return %c0_i32, %c0_i32_0 : i32, i32
  }
  func.func @transform_8(%arg0: i32) -> (i32, i32) {
    %c0_i32 = arith.constant 0 : i32
    %c0_i32_0 = arith.constant 0 : i32
    %c0_i32_1 = arith.constant 0 : i32
    return %c0_i32, %c0_i32_0 : i32, i32
  }
  func.func @transform_9(%arg0: i32) -> (i32, i32, i32) {
    %c0_i32 = arith.constant 0 : i32
    %c0_i32_0 = arith.constant 0 : i32
    %c0_i32_1 = arith.constant 0 : i32
    return %arg0, %c0_i32, %c0_i32_0 : i32, i32, i32
  }
  func.func @transform_10(%arg0: i32) -> (i32, i32, i32, i32) {
    %c0_i32 = arith.constant 0 : i32
    %c0_i32_0 = arith.constant 0 : i32
    %c0_i32_1 = arith.constant 0 : i32
    %c0_i32_2 = arith.constant 0 : i32
    return %arg0, %c0_i32, %c0_i32_0, %c0_i32_1 : i32, i32, i32, i32
  }
}

</mosaic_0001>

<bundles_post_ra>
// kernel: tpu_custom_call.1
= control target key start
LH: loop header
LB: loop body
LE: loop exit
PB: predicated region body
PF: predicated region fallthrough
CT: control target
= control target key end

     0   :  { %s4096_s0 = inlined_call_operand.hbm [shape: f32[2,16,128], index: 0, kind: input, shape index: {}]   ;;  %s4097_s1 = inlined_call_operand.hbm [shape: f32[2,16,128], index: 1, kind: input, shape index: {}]   ;;  %s4098_s2 = inlined_call_operand.hbm [shape: f32[2,16,128], index: 2, kind: input, shape index: {}]   ;;  %s4099_s3 = inlined_call_operand.hbm [shape: f32[128,128], index: 3, kind: input, shape index: {}]   ;;  %s4100_s4 = inlined_call_operand.hbm [shape: f32[128,128], index: 4, kind: input, shape index: {}]   ;;  %s4101_s5 = inlined_call_operand.hbm [shape: f32[128,128], index: 5, kind: input, shape index: {}]   ;;  %s4102_s6 = inlined_call_operand.hbm [shape: f32[128,128], index: 6, kind: input, shape index: {}]   ;;  %s4103_s7 = inlined_call_operand.hbm [shape: f32[1,128], index: 7, kind: input, shape index: {}]   ;;  %s4104_s8 = inlined_call_operand.hbm [shape: f32[1,128], index: 8, kind: input, shape index: {}]   ;;  %s4105_s9 = inlined_call_operand.hbm [shape: f32[2,16,128], index: 9, kind: output, shape index: {0}]   ;;  %s4106_s10 = inlined_call_operand.hbm [shape: f32[2,4,16,16], index: 10, kind: output, shape index: {1}]  }
   0x1   :  { %4135 = sst [smem:[#allocation34_spill]] %s4097_s1 }
   0x2   :  { %4136 = sst [smem:[#allocation35_spill]] %s4099_s3 }
   0x3   :  { %4137 = sst [smem:[#allocation36_spill]] %s4101_s5 }
   0x4   :  { %4138 = sst [smem:[#allocation37_spill]] %s4103_s7 }
   0x5   :  { %4139 = sst [smem:[#allocation38_spill]] %s4105_s9 }
   0x6   :  { %4140 = sst [smem:[#allocation39_spill]] %s4106_s10 }
   0x7   :  { %16 = vsyncpa [#allocation3], 0 }
   0x8   :  { %18 = vsyncpa [#allocation3 + $0x1], 0 }
   0x9   :  { %19 = vsyncpa [#allocation6], 0 }
   0xa   :  { %21 = vsyncpa [#allocation6 + $0x1], 0 }
   0xb   :  { %22 = vsyncpa [#allocation9], 0 }
   0xc   :  { %23 = vsyncpa [#allocation12], 0 }
   0xd   :  { %24 = vsyncpa [#allocation15], 0 }
   0xe   :  { %25 = vsyncpa [#allocation4], 0 }
   0xf   :  { %27 = vsyncpa [#allocation4 + $0x1], 0 }
  0x10   :  { %28 = vsyncpa [#allocation19], 0 }
  0x11   :  { %30 = vsyncpa [#allocation19 + $0x1], 0  ;;  %s3484_s13 = smov 0   ;;  %s3486_s14 = smov 0  }
  0x12   :  { %s3488_s15 = smov 0   ;;  %s3490_s16 = smov 0  }
  0x13 LB: > { %4141 = sst [smem:[#allocation27_spill]] %s3397_s13  ;;  %s3411_s17 = smov [#allocation8]   ;;  %s3409_s16 = sphi %s3490_s16, %s4187_s16   ;;  %s3405_s15 = sphi %s3488_s15, %s4191_s15   ;;  %s3401_s14 = sphi %s3486_s14, %s4190_s14   ;;  %s3397_s13 = sphi %s3484_s13, %s4189_s13  }
  0x14   : > { %4142 = sst [smem:[#allocation28_spill]] %s3409_s16  ;;  %s309_s18 = sshll.u32 %s3411_s17, 4  ;;  %s3510_s18 = int_to_ptr.vmem [resolvable:$true] %s309_s18 }
  0x15   : > { %s3505_s19 = sadd.s32 4294967295, %s3409_s16   ;;  %p2271_p0 = scmp.ge.s32.totalorder %s3409_s16, 1 }
  0x16   : > { %4143 = sst [smem:[#allocation29_spill]] %s3505_s19  ;;  %p4117_p1 = scmp.eq.s32.totalorder %s3505_s19, 0 }
  0x17   : > { %p297_p2 = scmp.lt.s32.totalorder %s3409_s16, 3  ;;  %s3412_s21 = smov [#allocation11]  }
  0x18   : > { %s335_s22 = sshll.u32 %s3412_s21, 4  ;;  %s3413_s24 = smov [#allocation14]   ;;  %s3525_s22 = int_to_ptr.vmem [resolvable:$true] %s335_s22 }
  0x19   : > { %p3512_p3 = pnand %p2271_p0, %p297_p2  ;;  %s362_s25 = sshll.u32 %s3413_s24, 4  ;;  %s3527_s25 = int_to_ptr.vmem [resolvable:$true] %s362_s25 }
  0x1a   : > { %s4146_s3 = sld [smem:[#allocation35_spill]] }
  0x1b   : > { %s4144_s20 = scalar_select %p3512_p3, 1, 0 }
  0x1c   : > { %p2876_p5 = pneg %p3512_p3 }
  0x1e   : > { %p3521_p6 = pnand %p2876_p5, %p4117_p1 }
  0x20   : > { %s4145_s23 = scalar_select %p3521_p6, 1, 0 }
  0x21   : > { %s3037_s28 = scalar_lea.hbm %s4146_s3, 2048  ;;  %p3537_p8 = pneg %p3521_p6 }
  0x22   : > { %p3038_p7 = scmp.ne.s32.totalorder %s4146_s3, %s3037_s28  ;;  %p3044_p11 = scmp.lt.u32.totalorder %s3037_s28, %s4146_s3 }
  0x23   : > { %s4147_s11 = scalar_select %p3537_p8, 1, 0 }
  0x24   : > { %p3040_p9 = pnand %p3537_p8, %p3038_p7 }
  0x26   : > { %p3041_p10 = pneg %p3040_p9 }
  0x28   : > { %p3046_p12 = pnand %p3044_p11, %p3041_p10 }
  0x2a   : > { %3049 = shalt.err (!%p3046_p12)
}
  0x2b   : > { %s3050_s21 = scalar_lea.vmem %s3510_s18, 2048  ;;  %p3058_p5 = scmp.lt.s32.totalorder %s3510_s18, %s3510_s18 }
  0x2c   : > { %p3051_p13 = scmp.ne.s32.totalorder %s3510_s18, %s3050_s21  ;;  %p3059_p4 = scmp.lt.s32.totalorder %s3050_s21, %s3050_s21 }
  0x2e   : > { %p3053_p0 = pnand %p3051_p13, %p3537_p8  ;;  %p3060_p7 = por %p3059_p4, %p3058_p5 }
  0x30   : > { %p3054_p2 = pneg %p3053_p0 }
  0x32   : > { %p3061_p9 = pnand %p3060_p7, %p3054_p2 }
  0x34   : > { %3064 = shalt.err (!%p3061_p9)
}
  0x35   : > { %s4110_s24 = smov 128   ;;  %s4113_s26 = smov 8  }
  0x36   : > { %2879 = dma.hbm_to_vmem [thread:$0]  (!%p3521_p6), %s4146_s3, 2048, %s3510_s18, [#allocation9], %s4110_s24, %s4110_s24, %s4113_s26  }
  0x37   : > { %s4148_s5 = sld [smem:[#allocation36_spill]] }
  0x3d   : > { %s3065_s12 = scalar_lea.hbm %s4148_s5, 2048 }
  0x3e   : > { %p3066_p4 = scmp.ne.s32.totalorder %s4148_s5, %s3065_s12  ;;  %p3072_p12 = scmp.lt.u32.totalorder %s3065_s12, %s4148_s5 }
  0x40   : > { %p3068_p10 = pnand %p3066_p4, %p3537_p8 }
  0x42   : > { %p3069_p11 = pneg %p3068_p10 }
  0x44   : > { %p3074_p13 = pnand %p3072_p12, %p3069_p11 }
  0x46   : > { %3077 = shalt.err (!%p3074_p13)
}
  0x47   : > { %s3078_s18 = scalar_lea.vmem %s3525_s22, 2048  ;;  %p3086_p7 = scmp.lt.s32.totalorder %s3525_s22, %s3525_s22 }
  0x48   : > { %p3079_p0 = scmp.ne.s32.totalorder %s3525_s22, %s3078_s18  ;;  %p3087_p9 = scmp.lt.s32.totalorder %s3078_s18, %s3078_s18 }
  0x4a   : > { %p3081_p2 = pnand %p3079_p0, %p3537_p8  ;;  %p3088_p4 = por %p3087_p9, %p3086_p7 }
  0x4c   : > { %p3082_p5 = pneg %p3081_p2 }
  0x4e   : > { %p3089_p10 = pnand %p3088_p4, %p3082_p5 }
  0x50   : > { %3092 = shalt.err (!%p3089_p10)
}
  0x51   : > { %2885 = dma.hbm_to_vmem [thread:$0]  (!%p3521_p6), %s4148_s5, 2048, %s3525_s22, [#allocation12], %s4110_s24, %s4110_s24, %s4113_s26  }
  0x52   : > { %s4149_s7 = sld [smem:[#allocation37_spill]] }
  0x58   : > { %s3093_s29 = scalar_lea.hbm %s4149_s7, 16 }
  0x59   : > { %p3094_p11 = scmp.ne.s32.totalorder %s4149_s7, %s3093_s29  ;;  %p3100_p0 = scmp.lt.u32.totalorder %s3093_s29, %s4149_s7 }
  0x5b   : > { %p3096_p12 = pnand %p3094_p11, %p3537_p8 }
  0x5d   : > { %p3097_p13 = pneg %p3096_p12 }
  0x5f   : > { %p3102_p2 = pnand %p3100_p0, %p3097_p13 }
  0x61   : > { %3105 = shalt.err (!%p3102_p2)
}
  0x62   : > { %s3106_s22 = scalar_lea.vmem %s3527_s25, 16  ;;  %s3113_s18 = scalar_lea.vmem %s3527_s25, 32 }
  0x63   : > { %p3107_p5 = scmp.ne.s32.totalorder %s3527_s25, %s3106_s22  ;;  %p3114_p4 = scmp.lt.s32.totalorder %s3527_s25, %s3527_s25 }
  0x64   : > { %p3115_p10 = scmp.lt.s32.totalorder %s3113_s18, %s3106_s22 }
  0x65   : > { %p3109_p7 = pnand %p3107_p5, %p3537_p8 }
  0x66   : > { %p3116_p11 = por %p3115_p10, %p3114_p4 }
  0x67   : > { %p3110_p9 = pneg %p3109_p7 }
  0x69   : > { %p3117_p12 = pnand %p3116_p11, %p3110_p9 }
  0x6b   : > { %3120 = shalt.err (!%p3117_p12)
}
  0x6c   : > { %2891 = dma.hbm_to_vmem [thread:$0]  (!%p3521_p6), %s4149_s7, 16, %s3527_s25, [#allocation15]  }
  0x6d   : > { %s2270_s27 = sadd.s32 4294967294, %s3409_s16   ;;  %s3613_s28 = sadd.s32 1, %s3409_s16  }
  0x6e   : > { %4150 = sst [smem:[#allocation30_spill]] %s3613_s28  ;;  %s43_s29 = sadd.s32 1, %s3405_s15 }
  0x6f   : > { %s40_s30 = ssub.s32 %s3409_s16, %s3613_s28  ;;  %p50_p13 = scmp.ne.s32.totalorder %s3405_s15, %s3401_s14 }
  0x70   : > { %p41_p0 = scmp.eq.s32.totalorder %s40_s30, 0  ;;  %p51_p2 = scmp.eq.s32.totalorder %s3409_s16, 0 }
  0x71   : > { %p56_p5 = scmp.ne.s32.totalorder %s3401_s14, %s3397_s13  ;;  %p258_p7 = scmp.eq.s32.totalorder %s3505_s19, 1 }
  0x72   : > { %s3625_s12 = scalar_select %p41_p0, %s3405_s15, %s43_s29  }
  0x73   : > { %p52_p9 = por %p51_p2, %p50_p13  ;;  %p3629_p4 = por %p4117_p1, %p56_p5 }
  0x74   : > { %4151 = sst [smem:[#allocation31_spill]] %s3625_s12  ;;  %p3633_p10 = por %p258_p7, %p50_p13 }
  0x75   : > { %s4152_s25 = scalar_select %p3629_p4, 1, 0 }
  0x76   : > { %s4153_s17 = scalar_select %p3633_p10, 1, 0 }
  0x77   : > { %p264_p11 = scmp.eq.s32.totalorder %s2270_s27, 1  ;;  %p2918_p12 = scmp.lt.s32.totalorder %s3409_s16, 2 }
  0x78   : > { %4154 = sst [smem:[#allocation32_spill]] %s4153_s17  ;;  %s4112_s21 = sand.u32 1, %s3405_s15  }
  0x79   : > { %p3639_p3 = por %p264_p11, %p56_p5  ;;  %s3645_s18 = sshll.u32 %s4112_s21, 4 }
  0x7a   : > { %s3648_s9 = sshll.u32 %s3409_s16, 8  ;;  %p3650_p0 = pnand %p2918_p12, %p52_p9 }
  0x7b   : > { %s4155_s22 = scalar_select %p3639_p3, 1, 0 }
  0x7c   : > { %s4157_s10 = scalar_select %p3650_p0, 1, 0 }
  0x7d   : > { %4156 = sst [smem:[#allocation33_spill]] %s4155_s22  ;;  %s405_s29 = sand.u32 1, %s3409_s16  }
  0x7e   : > { %s4158_s1 = sld [smem:[#allocation34_spill]]  ;;  %s409_s21 = scalar_lea.vmem [#allocation5], %s3645_s18 }
  0x7f   : > { %s416_s26 = sshll.u32 %s409_s21, 4  ;;  %s3664_s3 = scalar_lea.sflag [#allocation6], %s405_s29  ;;  %s3662_s26 = int_to_ptr.vmem [resolvable:$true] %s416_s26 }
  0x80   : > { %p3670_p2 = pneg %p3650_p0 }
  0x82   : > { %s4159_s7 = scalar_select %p3670_p2, 1, 0 }
  0x84   : > { %s3659_s24 = scalar_lea.hbm %s4158_s1, %s3648_s9  ;;  %s3126_s12 = scalar_lea.hbm %s4158_s1, 512 }
  0x85   : > { %s3121_s5 = scalar_lea.hbm %s3659_s24, 256  ;;  %p3127_p9 = scmp.lt.u32.totalorder %s3659_s24, %s4158_s1 }
  0x86   : > { %p3122_p13 = scmp.ne.s32.totalorder %s3659_s24, %s3121_s5  ;;  %p3128_p11 = scmp.lt.u32.totalorder %s3126_s12, %s3121_s5 }
  0x87   : > { %p3130_p1 = scmp.lt.u32.totalorder %s3121_s5, %s3659_s24 }
  0x88   : > { %p3124_p5 = pnand %p3670_p2, %p3122_p13  ;;  %p3129_p12 = por %p3128_p11, %p3127_p9 }
  0x8a   : > { %p3125_p7 = pneg %p3124_p5  ;;  %p3131_p3 = por %p3130_p1, %p3129_p12 }
  0x8c   : > { %p3132_p10 = pnand %p3131_p3, %p3125_p7 }
  0x8e   : > { %3135 = shalt.err (!%p3132_p10)
}
  0x8f   : > { %s3136_s29 = scalar_lea.vmem %s3662_s26, 256  ;;  %s3416_s27 = smov [#allocation5]  }
  0x90   : > { %p3137_p13 = scmp.ne.s32.totalorder %s3662_s26, %s3136_s29  ;;  %s3141_s30 = sshll.u32 %s3416_s27, 4  ;;  %s3142_s30 = int_to_ptr.vmem [resolvable:$false] %s3141_s30 }
  0x91   : > { %s3143_s28 = scalar_lea.vmem %s3142_s30, 512  ;;  %p3144_p6 = scmp.lt.s32.totalorder %s3662_s26, %s3142_s30 }
  0x92   : > { %p3139_p5 = pnand %p3137_p13, %p3670_p2  ;;  %p3145_p8 = scmp.lt.s32.totalorder %s3143_s28, %s3136_s29 }
  0x94   : > { %p3140_p4 = pneg %p3139_p5  ;;  %p3146_p9 = por %p3145_p8, %p3144_p6 }
  0x96   : > { %p3147_p11 = pnand %p3146_p9, %p3140_p4 }
  0x98   : > { %3150 = shalt.err (!%p3147_p11)
}
  0x99   : > { %s4160_s5 = smov 8   ;;  %s4161_s12 = smov 128  }
  0x9a   : > { %2901 = dma.hbm_to_vmem [thread:$0]  (!%p3650_p0), %s3659_s24, 256, %s3662_s26, %s3664_s3, %s4161_s12, %s4161_s12, %s4160_s5  }
  0x9b   : > { %s3417_s21 = smov [#allocation10]   ;;  %s3418_s27 = smov [#allocation13]  }
  0x9c   : > { %s322_s1 = sshll.u32 %s3417_s21, 4  ;;  %s348_s16 = sshll.u32 %s3418_s27, 4  ;;  %s323_s1 = int_to_ptr.vmem [resolvable:$true] %s322_s1  ;;  %s349_s16 = int_to_ptr.vmem [resolvable:$true] %s348_s16 }
  0x9d   : > { %s3151_s28 = scalar_lea.hbm %s4100_s4, 2048  ;;  %p4162_p3 = scmp.ne.s32.totalorder %s4147_s11, 0 }
  0x9e   : > { %p3152_p1 = scmp.ne.s32.totalorder %s4100_s4, %s3151_s28  ;;  %p3158_p4 = scmp.lt.u32.totalorder %s3151_s28, %s4100_s4 }
  0xa0   : > { %p3154_p6 = pnand %p3152_p1, %p4162_p3 }
  0xa2   : > { %p3155_p8 = pneg %p3154_p6 }
  0xa4   : > { %p3160_p10 = pnand %p3158_p4, %p3155_p8 }
  0xa6   : > { %3163 = shalt.err (!%p3160_p10)
}
  0xa7   : > { %s3164_s24 = scalar_lea.vmem %s323_s1, 2048  ;;  %p3172_p5 = scmp.lt.s32.totalorder %s323_s1, %s323_s1 }
  0xa8   : > { %p3165_p7 = scmp.ne.s32.totalorder %s323_s1, %s3164_s24  ;;  %p3173_p9 = scmp.lt.s32.totalorder %s3164_s24, %s3164_s24 }
  0xaa   : > { %p3167_p12 = pnand %p3165_p7, %p4162_p3  ;;  %p3174_p11 = por %p3173_p9, %p3172_p5 }
  0xac   : > { %p3168_p13 = pneg %p3167_p12 }
  0xae   : > { %p3175_p0 = pnand %p3174_p11, %p3168_p13 }
  0xb0   : > { %3178 = shalt.err (!%p3175_p0)
}
  0xb1   : > { %p4163_p1 = scmp.ne.s32.totalorder %s4145_s23, 0  ;;  %s3179_s22 = scalar_lea.hbm %s4102_s6, 2048 }
  0xb2   : > { %p3180_p6 = scmp.ne.s32.totalorder %s4102_s6, %s3179_s22  ;;  %p3186_p4 = scmp.lt.u32.totalorder %s3179_s22, %s4102_s6 }
  0xb3   : > { %2882 = dma.hbm_to_vmem [thread:$0]  (!%p4163_p1), %s4100_s4, 2048, %s323_s1, [#allocation9], %s4161_s12, %s4161_s12, %s4160_s5  }
  0xb4   : > { %p3182_p0 = pnand %p3180_p6, %p4162_p3 }
  0xb6   : > { %p3183_p8 = pneg %p3182_p0 }
  0xb8   : > { %p3188_p10 = pnand %p3186_p4, %p3183_p8 }
  0xba   : > { %3191 = shalt.err (!%p3188_p10)
}
  0xbb   : > { %s3192_s28 = scalar_lea.vmem %s349_s16, 2048  ;;  %p3200_p5 = scmp.lt.s32.totalorder %s349_s16, %s349_s16 }
  0xbc   : > { %p3193_p7 = scmp.ne.s32.totalorder %s349_s16, %s3192_s28  ;;  %p3201_p9 = scmp.lt.s32.totalorder %s3192_s28, %s3192_s28 }
  0xbe   : > { %p3195_p12 = pnand %p3193_p7, %p4162_p3  ;;  %p3202_p11 = por %p3201_p9, %p3200_p5 }
  0xc0   : > { %p3196_p13 = pneg %p3195_p12 }
  0xc2   : > { %p3203_p2 = pnand %p3202_p11, %p3196_p13 }
  0xc4   : > { %3206 = shalt.err (!%p3203_p2)
}
  0xc5   : > { %2888 = dma.hbm_to_vmem [thread:$0]  (!%p4163_p1), %s4102_s6, 2048, %s349_s16, [#allocation12], %s4161_s12, %s4161_s12, %s4160_s5  }
  0xc6   : > { %s3419_s13 = smov [#allocation16]   ;;  %s3207_s22 = scalar_lea.hbm %s4104_s8, 16 }
  0xc7   : > { %s373_s19 = sshll.u32 %s3419_s13, 4  ;;  %p3208_p2 = scmp.ne.s32.totalorder %s4104_s8, %s3207_s22  ;;  %s374_s19 = int_to_ptr.vmem [resolvable:$true] %s373_s19 }
  0xc8   : > { %p3214_p8 = scmp.lt.u32.totalorder %s3207_s22, %s4104_s8 }
  0xc9   : > { %p3210_p6 = pnand %p3208_p2, %p4162_p3 }
  0xcb   : > { %p3211_p0 = pneg %p3210_p6 }
  0xcd   : > { %p3216_p4 = pnand %p3214_p8, %p3211_p0 }
  0xcf   : > { %3219 = shalt.err (!%p3216_p4)
}
  0xd0   : > { %s3220_s16 = scalar_lea.vmem %s374_s19, 16  ;;  %s3227_s28 = scalar_lea.vmem %s374_s19, 32 }
  0xd1   : > { %p3221_p10 = scmp.ne.s32.totalorder %s374_s19, %s3220_s16  ;;  %p3228_p13 = scmp.lt.s32.totalorder %s374_s19, %s374_s19 }
  0xd2   : > { %p3229_p5 = scmp.lt.s32.totalorder %s3227_s28, %s3220_s16 }
  0xd3   : > { %p3223_p7 = pnand %p3221_p10, %p4162_p3 }
  0xd4   : > { %p3230_p9 = por %p3229_p5, %p3228_p13 }
  0xd5   : > { %p3224_p12 = pneg %p3223_p7 }
  0xd7   : > { %p3231_p11 = pnand %p3230_p9, %p3224_p12 }
  0xd9   : > { %3234 = shalt.err (!%p3231_p11)
}
  0xda   : > { %2894 = dma.hbm_to_vmem [thread:$0]  (!%p4163_p1), %s4104_s8, 16, %s374_s19, [#allocation15]  }
  0xdb   : > { %s3761_s26 = scalar_lea.hbm %s4096_s0, %s3648_s9  ;;  %s388_s17 = scalar_lea.vmem [#allocation2], %s3645_s18 }
  0xdc   : > { %s395_s22 = sshll.u32 %s388_s17, 4  ;;  %s4164_s23 = sand.u32 1, %s3405_s15   ;;  %s3764_s22 = int_to_ptr.vmem [resolvable:$true] %s395_s22 }
  0xdd   : > { %s3768_s21 = scalar_lea.sflag [#allocation3], %s4164_s23  ;;  %s3235_s27 = scalar_lea.hbm %s3761_s26, 256 }
  0xde   : > { %p3236_p3 = scmp.ne.s32.totalorder %s3761_s26, %s3235_s27  ;;  %p4165_p2 = scmp.ne.s32.totalorder %s4159_s7, 0 }
  0xdf   : > { %s3240_s29 = scalar_lea.hbm %s4096_s0, 512  ;;  %p3241_p0 = scmp.lt.u32.totalorder %s3761_s26, %s4096_s0 }
  0xe0   : > { %p3238_p1 = pnand %p3236_p3, %p4165_p2  ;;  %p3242_p8 = scmp.lt.u32.totalorder %s3240_s29, %s3235_s27 }
  0xe1   : > { %p3244_p10 = scmp.lt.u32.totalorder %s3235_s27, %s3761_s26 }
  0xe2   : > { %p3239_p6 = pneg %p3238_p1  ;;  %p3243_p4 = por %p3242_p8, %p3241_p0 }
  0xe4   : > { %p3245_p7 = por %p3244_p10, %p3243_p4 }
  0xe6   : > { %p3246_p12 = pnand %p3245_p7, %p3239_p6 }
  0xe8   : > { %3249 = shalt.err (!%p3246_p12)
}
  0xe9   : > { %s3250_s1 = scalar_lea.vmem %s3764_s22, 256  ;;  %s3420_s24 = smov [#allocation2]  }
  0xea   : > { %p3251_p13 = scmp.ne.s32.totalorder %s3764_s22, %s3250_s1  ;;  %s3255_s13 = sshll.u32 %s3420_s24, 4  ;;  %s3256_s13 = int_to_ptr.vmem [resolvable:$false] %s3255_s13 }
  0xeb   : > { %s3257_s11 = scalar_lea.vmem %s3256_s13, 512  ;;  %p3258_p11 = scmp.lt.s32.totalorder %s3764_s22, %s3256_s13 }
  0xec   : > { %p3253_p5 = pnand %p3251_p13, %p4165_p2  ;;  %p3259_p3 = scmp.lt.s32.totalorder %s3257_s11, %s3250_s1 }
  0xee   : > { %p3254_p9 = pneg %p3253_p5  ;;  %p3260_p1 = por %p3259_p3, %p3258_p11 }
  0xf0   : > { %p3261_p0 = pnand %p3260_p1, %p3254_p9 }
  0xf2   : > { %3264 = shalt.err (!%p3261_p0)
}
  0xf3   : > { %p4166_p6 = scmp.ne.s32.totalorder %s4157_s10, 0  ;;  %s3799_s27 = scalar_lea.hbm %s4098_s2, %s3648_s9 }
  0xf4   : > { %s430_s19 = scalar_lea.vmem [#allocation7], %s3645_s18  ;;  %s3265_s29 = scalar_lea.hbm %s3799_s27, 256 }
  0xf5   : > { %2898 = dma.hbm_to_vmem [thread:$0]  (!%p4166_p6), %s3761_s26, 256, %s3764_s22, %s3768_s21, %s4161_s12, %s4161_s12, %s4160_s5  }
  0xf6   : > { %s437_s30 = sshll.u32 %s430_s19, 4  ;;  %p3266_p8 = scmp.ne.s32.totalorder %s3799_s27, %s3265_s29  ;;  %s3802_s30 = int_to_ptr.vmem [resolvable:$true] %s437_s30 }
  0xf7   : > { %s3270_s22 = scalar_lea.hbm %s4098_s2, 512  ;;  %p3271_p7 = scmp.lt.u32.totalorder %s3799_s27, %s4098_s2 }
  0xf8   : > { %p3268_p4 = pnand %p3266_p8, %p4165_p2  ;;  %p3272_p12 = scmp.lt.u32.totalorder %s3270_s22, %s3265_s29 }
  0xf9   : > { %p3274_p5 = scmp.lt.u32.totalorder %s3265_s29, %s3799_s27 }
  0xfa   : > { %p3269_p10 = pneg %p3268_p4  ;;  %p3273_p13 = por %p3272_p12, %p3271_p7 }
  0xfc   : > { %p3275_p9 = por %p3274_p5, %p3273_p13 }
  0xfe   : > { %p3276_p11 = pnand %p3275_p9, %p3269_p10 }
 0x100   : > { %3279 = shalt.err (!%p3276_p11)
}
 0x101   : > { %s3280_s18 = scalar_lea.vmem %s3802_s30, 256  ;;  %s3421_s28 = smov [#allocation7]  }
 0x102   : > { %p3281_p3 = scmp.ne.s32.totalorder %s3802_s30, %s3280_s18  ;;  %s3285_s1 = sshll.u32 %s3421_s28, 4  ;;  %s3286_s1 = int_to_ptr.vmem [resolvable:$false] %s3285_s1 }
 0x103   : > { %s3287_s24 = scalar_lea.vmem %s3286_s1, 512  ;;  %p3288_p8 = scmp.lt.s32.totalorder %s3802_s30, %s3286_s1 }
 0x104   : > { %p3283_p1 = pnand %p3281_p3, %p4165_p2  ;;  %p3289_p4 = scmp.lt.s32.totalorder %s3287_s24, %s3280_s18 }
 0x106   : > { %p3284_p0 = pneg %p3283_p1  ;;  %p3290_p7 = por %p3289_p4, %p3288_p8 }
 0x108   : > { %p3291_p12 = pnand %p3290_p7, %p3284_p0 }
 0x10a   : > { %3294 = shalt.err (!%p3291_p12)
}
 0x10b   : > { %2904 = dma.hbm_to_vmem [thread:$0]  (!%p4166_p6), %s3799_s27, 256, %s3802_s30, %s3664_s3, %s4161_s12, %s4161_s12, %s4160_s5  }
 0x10c   : > { %p4167_p2 = scmp.ne.s32.totalorder %s4144_s20, 0 }
 0x10d   : > { %s3832_s7 = sand.u32 (!%p4167_p2), 1, %s3401_s14   ;;  %p4168_p10 = scmp.ne.s32.totalorder (!%p4167_p2), %s4152_s25, 0 }
 0x10e   : > { %449 = sbr.rel (%p4167_p2) target bundleno = 2941 (0xb7d), region = 56  ;;  %s3835_s13 = sshll.u32 (!%p4167_p2), %s3832_s7, 4 }
 0x10f   : > { %s452_s10 = scalar_lea.sflag (!%p4167_p2), [#allocation3], %s3832_s7  ;;  %s455_s11 = scalar_lea.vmem (!%p4167_p2), [#allocation2], %s3835_s13 }
 0x115   : > { %3368 = dma.done.wait (%p4168_p10), %s452_s10, 256  }
 0x116   : > { %3370 = vsyncadd (%p4168_p10), %s452_s10, 4294967040  ;;  %s4169_s3 = sld [smem:[#allocation29_spill]]  ;;  %s464_s12 = scalar_lea.vmem [#allocation5], %s3835_s13 }
 0x11c   : > { %s460_s20 = sand.u32 1, %s4169_s3  }
 0x11d   : > { %s461_s5 = scalar_lea.sflag [#allocation6], %s460_s20 }
 0x11e   : > { %3372 = dma.done.wait (%p4168_p10), %s461_s5, 512  }
 0x11f   : > { %3374 = vsyncadd (%p4168_p10), %s461_s5, 4294966784  ;;  %s473_s17 = scalar_lea.vmem [#allocation7], %s3835_s13  ;;  %p4170_p6 = scmp.eq.s32.totalorder %s4169_s3, 0 }
 0x121   : > { %3376 = dma.done.wait (%p4170_p6), [#allocation9], 4096   ;;  %p4171_p13 = pmov %p4170_p6 }
 0x122   : > { %p4172_p5 = pmov %p4170_p6 }
 0x123   : > { %3378 = vsyncadd (%p4171_p13), [#allocation9], 4294963200 }
 0x124   : > { %3380 = dma.done.wait (%p4172_p5), [#allocation12], 4096   ;;  %p4173_p9 = pmov %p4172_p5 }
 0x125   : > { %p4174_p11 = pmov %p4172_p5 }
 0x126   : > { %3382 = vsyncadd (%p4173_p9), [#allocation12], 4294963200 }
 0x127   : > { %3384 = dma.done.wait (%p4174_p11), [#allocation15], 32   ;;  %p4175_p3 = pmov %p4172_p5 }
 0x128   : > { %v646_v0 = vld [vmem:[#allocation10] sm:$0xff]  ;;  %v647_v1 = vld [vmem:[#allocation10 + $0x8] sm:$0xff]  ;;  %v648_v2 = vld [vmem:[#allocation10 + $0x10] sm:$0xff]  ;;  %vm828_vm0 = vcmask 261120   ;;  %s3422_s25 = smov 64   ;;  %vm918_vm2 = vcmask 130048  }
 0x129   : > { %3386 = vsyncadd (%p4175_p3), [#allocation15], 4294967264  ;;  %v2700_v3 = vpack.c.bf16 %v647_v1, %v646_v0  ;;  %v649_v4 = vld [vmem:[#allocation10 + $0x18] sm:$0xff]  ;;  %v555_v5 = vld [vmem:[#allocation8] sm:$0xff]  ;;  %s3423_s23 = smov 96   ;;  %s2299_s27 = sshll.u32 %s3832_s7, 6 }
 0x12a   : > { %v556_v6 = vld [vmem:[#allocation8 + $0x8] sm:$0xff]  ;;  %v2704_v7 = vpack.c.bf16 %v649_v4, %v648_v2  ;;  %v650_v9 = vld [vmem:[#allocation10 + $0x20] sm:$0xff]  ;;  %v557_v11 = vld [vmem:[#allocation8 + $0x10] sm:$0xff]  ;;  %s3922_s19 = scalar_lea.vmem [#allocation18], %s2299_s27  ;;  %s3424_s30 = smov 32  }
 0x12b   : > { %v2668_v8 = vpack.c.bf16 %v556_v6, %v555_v5  ;;  %v651_v10 = vld [vmem:[#allocation10 + $0x28] sm:$0xff]  ;;  %2701 = vmatprep.subr.bf16.mxu1 %v2700_v3  ;;  %v558_v12 = vld [vmem:[#allocation8 + $0x18] sm:$0xff]  ;;  %v559_v14 = vld [vmem:[#allocation8 + $0x20] sm:$0xff]  ;;  %s4178_s29 = sld [smem:[#allocation32_spill]]  ;;  %s2352_s16 = sshll.u32 %s4169_s3, 10 }
 0x12c   : > { %2703 = vmatpush3.bf16.msra.mxu1 %v2700_v3  ;;  %v2672_v13 = vpack.c.bf16 %v558_v12, %v557_v11  ;;  %v560_v15 = vld [vmem:[#allocation8 + $0x28] sm:$0xff]  ;;  %v2708_v16 = vpack.c.bf16 %v651_v10, %v650_v9  ;;  %v652_v17 = vld [vmem:[#allocation10 + $0x30] sm:$0xff]  ;;  %v653_v18 = vld [vmem:[#allocation10 + $0x38] sm:$0xff]  ;;  %s2065_s26 = sshll.u32 %s3922_s19, 4  ;;  %s4179_s9 = sld [smem:[#allocation39_spill]]  ;;  %s4013_s26 = int_to_ptr.vmem [resolvable:$true] %s2065_s26 }
 0x12d   : > { %2669 = vmatprep.subr.bf16.mxu0 %v2668_v8  ;;  %2705 = vmatprep.subr.bf16.mxu1 %v2704_v7  ;;  %v2676_v19 = vpack.c.bf16 %v560_v15, %v559_v14  ;;  %v561_v20 = vld [vmem:[#allocation8 + $0x30] sm:$0xff]  ;;  %v562_v21 = vld [vmem:[#allocation8 + $0x38] sm:$0xff]  ;;  %v2712_v22 = vpack.c.bf16 %v653_v18, %v652_v17  ;;  %v654_v24 = vld [vmem:[#allocation10 + $0x40] sm:$0xff]  ;;  %s2036_s28 = scalar_lea.sflag [#allocation19], %s3832_s7  ;;  %s3295_s1 = scalar_lea.vmem %s4013_s26, 1024 }
 0x12e   : > { %2671 = vmatpush3.bf16.msra.mxu0 %v2668_v8  ;;  %v551_v23 = vld [vmem:[%s464_s12] sm:$0xff]  ;;  %v655_v25 = vld [vmem:[#allocation10 + $0x48] sm:$0xff]  ;;  %v2680_v26 = vpack.c.bf16 %v562_v21, %v561_v20  ;;  %v657_v32 = vld [vmem:[#allocation10 + $0x58] sm:$0xff]  ;;  %p3296_p1 = scmp.ne.s32.totalorder %s4013_s26, %s3295_s1  ;;  %s3425_s24 = smov [#allocation18]  }
 0x12f   : > { %2673 = vmatprep.subr.bf16.mxu0 %v2672_v13  ;;  %2530 = vmatprep.mubr.f32.mxu1 %v551_v23  ;;  %v563_v27 = vld [vmem:[#allocation8 + $0x40] sm:$0xff]  ;;  %v564_v28 = vld [vmem:[#allocation8 + $0x48] sm:$0xff]  ;;  %v2716_v30 = vpack.c.bf16 %v655_v25, %v654_v24  ;;  %v656_v31 = vld [vmem:[#allocation10 + $0x50] sm:$0xff]  ;;  %s3299_s10 = sshll.u32 %s3425_s24, 4  ;;  %s3300_s10 = int_to_ptr.vmem [resolvable:$false] %s3299_s10 }
 0x130   : > { %2707 = vmatpush3.bf16.msra.mxu1 %v2704_v7  ;;  %v549_v29 = vld [vmem:[%s455_s11] sm:$0xff]  ;;  %v2684_v33 = vpack.c.bf16 %v564_v28, %v563_v27  ;;  %v566_v35 = vld [vmem:[#allocation8 + $0x58] sm:$0xff]  ;;  %v2720_v36 = vpack.c.bf16 %v657_v32, %v656_v31  ;;  %v659_v38 = vld [vmem:[#allocation10 + $0x68] sm:$0xff]  ;;  %p3302_p7 = scmp.lt.s32.totalorder %s4013_s26, %s3300_s10 }
 0x131   : > { %2709 = vmatprep.subr.bf16.mxu1 %v2708_v16  ;;  %2495 = vmatprep.mubr.f32.mxu0 %v549_v29  ;;  %v565_v34 = vld [vmem:[#allocation8 + $0x50] sm:$0xff]  ;;  %v658_v37 = vld [vmem:[#allocation10 + $0x60] sm:$0xff]  ;;  %v568_v41 = vld [vmem:[#allocation8 + $0x68] sm:$0xff]  ;;  %p4180_p0 = scmp.ne.s32.totalorder %s4178_s29, 0 }
 0x132   : > { %2675 = vmatpush3.bf16.msra.mxu0 %v2672_v13  ;;  %v2688_v39 = vpack.c.bf16 %v566_v35, %v565_v34  ;;  %v567_v40 = vld [vmem:[#allocation8 + $0x60] sm:$0xff]  ;;  %v2724_v42 = vpack.c.bf16 %v659_v38, %v658_v37  ;;  %v660_v43 = vld [vmem:[#allocation10 + $0x70] sm:$0xff]  ;;  %v661_v44 = vld [vmem:[#allocation10 + $0x78] sm:$0xff]  ;;  %s4011_s18 = scalar_lea.hbm %s4179_s9, %s2352_s16 }
 0x133   : > { %2677 = vmatprep.subr.bf16.mxu0 %v2676_v19  ;;  %v2692_v45 = vpack.c.bf16 %v568_v41, %v567_v40  ;;  %v569_v46 = vld [vmem:[#allocation8 + $0x70] sm:$0xff]  ;;  %v570_v47 = vld [vmem:[#allocation8 + $0x78] sm:$0xff]  ;;  %v2728_v48 = vpack.c.bf16 %v661_v44, %v660_v43  ;;  %v737_v52 = vld [vmem:[#allocation11] sm:$0xff]  ;;  %p3297_p8 = pnand %p3296_p1, %p4180_p0 }
 0x134   : > { %2711 = vmatpush3.bf16.msra.mxu1 %v2708_v16  ;;  %v2696_v49 = vpack.c.bf16 %v570_v47, %v569_v46  ;;  %v552_v50 = vld [vmem:[%s464_s12 + $0x8] sm:$0xff]  ;;  %v739_v54 = vld [vmem:[#allocation11 + $0x10] sm:$0xff]  ;;  %v741_v58 = vld [vmem:[#allocation11 + $0x20] sm:$0xff] }
 0x135   : > { %2713 = vmatprep.subr.bf16.mxu1 %v2712_v22  ;;  %v550_v51 = vld [vmem:[%s455_s11 + $0x8] sm:$0xff]  ;;  %v3872_v61 = vld [vmem:[%s473_s17] sm:$0xff]  ;;  %vm3877_vm1 = vmpackc.low %vm828_vm0, %vm828_vm0  ;;  %p3298_p4 = pneg %p3297_p8  ;;  %s3301_s11 = scalar_lea.vmem %s3300_s10, 2048 }
 0x136   : > { %2679 = vmatpush3.bf16.msra.mxu0 %v2676_v19  ;;  %v738_v53 = vld [vmem:[#allocation11 + $0x8] sm:$0xff]  ;;  %v740_v56 = vld [vmem:[#allocation11 + $0x18] sm:$0xff]  ;;  %v743_v62 = vld [vmem:[#allocation11 + $0x30] sm:$0xff]  ;;  %p3303_p12 = scmp.lt.s32.totalorder %s3301_s11, %s3295_s1 }
 0x137   : > { %2681 = vmatprep.subr.bf16.mxu0 %v2680_v26  ;;  %v2732_v55 = vpack.c.bf16 %v738_v53, %v737_v52  ;;  %v2736_v57 = vpack.c.bf16 %v740_v56, %v739_v54  ;;  %v742_v59 = vld [vmem:[#allocation11 + $0x28] sm:$0xff]  ;;  %v744_v63 = vld [vmem:[#allocation11 + $0x38] sm:$0xff]  ;;  %v745_v1 = vld [vmem:[#allocation11 + $0x40] sm:$0xff] }
 0x138   : > { %2715 = vmatpush3.bf16.msra.mxu1 %v2712_v22  ;;  %v2740_v60 = vpack.c.bf16 %v742_v59, %v741_v58  ;;  %v2744_v0 = vpack.c.bf16 %v744_v63, %v743_v62  ;;  %v746_v2 = vld [vmem:[#allocation11 + $0x48] sm:$0xff]  ;;  %v747_v11 = vld [vmem:[#allocation11 + $0x50] sm:$0xff]  ;;  %v748_v12 = vld [vmem:[#allocation11 + $0x58] sm:$0xff]  ;;  %p3304_p2 = por %p3303_p12, %p3302_p7 }
 0x139   : > { %2717 = vmatprep.subr.bf16.mxu1 %v2716_v30  ;;  %v2748_v7 = vpack.c.bf16 %v746_v2, %v745_v1  ;;  %v2752_v13 = vpack.c.bf16 %v748_v12, %v747_v11  ;;  %v749_v14 = vld [vmem:[#allocation11 + $0x60] sm:$0xff]  ;;  %v750_v15 = vld [vmem:[#allocation11 + $0x68] sm:$0xff]  ;;  %v751_v17 = vld [vmem:[#allocation11 + $0x70] sm:$0xff] }
 0x13a   : > { %2683 = vmatpush3.bf16.msra.mxu0 %v2680_v26  ;;  %v2756_v16 = vpack.c.bf16 %v750_v15, %v749_v14  ;;  %v752_v18 = vld [vmem:[#allocation11 + $0x78] sm:$0xff]  ;;  %p3305_p10 = pnand %p3304_p2, %p3298_p4 }
 0x13b   : > { %2685 = vmatprep.subr.bf16.mxu0 %v2684_v33  ;;  %v2760_v19 = vpack.c.bf16 %v752_v18, %v751_v17  ;;  %v3899_v20 = vld [vmem:[%s473_s17 + $0x8] sm:$0xff] }
 0x13c   : > { %2719 = vmatpush3.bf16.msra.mxu1 %v2716_v30 }
 0x13d   : > { %2721 = vmatprep.subr.bf16.mxu1 %v2720_v36 }
 0x13e   : > { %2687 = vmatpush3.bf16.msra.mxu0 %v2684_v33 }
 0x13f   : > { %2689 = vmatprep.subr.bf16.mxu0 %v2688_v39 }
 0x140   : > { %2723 = vmatpush3.bf16.msra.mxu1 %v2720_v36 }
 0x141   : > { %2725 = vmatprep.subr.bf16.mxu1 %v2724_v42 }
 0x142   : > { %2691 = vmatpush3.bf16.msra.mxu0 %v2688_v39 }
 0x143   : > { %2693 = vmatprep.subr.bf16.mxu0 %v2692_v45 }
 0x144   : > { %2727 = vmatpush3.bf16.msra.mxu1 %v2724_v42 }
 0x145   : > { %2729 = vmatprep.subr.bf16.mxu1 %v2728_v48 }
 0x146   : > { %2695 = vmatpush3.bf16.msra.mxu0 %v2692_v45 }
 0x147   : > { %2697 = vmatprep.subr.bf16.mxu0 %v2696_v49 }
 0x148   : > { %2731 = vmatpush3.bf16.msra.mxu1 %v2728_v48 }
 0x14a   : > { %2699 = vmatpush3.bf16.msra.mxu0 %v2696_v49 }
 0x14b   : > { %2531 = vmatmul.mubr.f32.vlgmr.msra.gmra.mrb[0].mxu1 %v552_v50  ;;  %2733 = vmatprep.subr.bf16.mxu0 %v2732_v55 }
 0x14d   : > { %2496 = vmatmul.mubr.f32.vlgmr.msra.gmra.mrb[0].mxu0 %v550_v51 }
 0x14e   : > { %2735 = vmatpush3.bf16.msra.mxu0 %v2732_v55  ;;  %2565 = vmatprep.mubr.f32.mxu0 %v3872_v61 }
 0x14f   : > { %2737 = vmatprep.subr.bf16.mxu0 %v2736_v57 }
 0x152   : > { %2739 = vmatpush3.bf16.msra.mxu0 %v2736_v57 }
 0x153   : > { %2741 = vmatprep.subr.bf16.mxu0 %v2740_v60 }
 0x156   : > { %2743 = vmatpush3.bf16.msra.mxu0 %v2740_v60 }
 0x157   : > { %2745 = vmatprep.subr.bf16.mxu0 %v2744_v0 }
 0x15a   : > { %2747 = vmatpush3.bf16.msra.mxu0 %v2744_v0 }
 0x15b   : > { %2749 = vmatprep.subr.bf16.mxu0 %v2748_v7 }
 0x15e   : > { %2751 = vmatpush3.bf16.msra.mxu0 %v2748_v7 }
 0x15f   : > { %2753 = vmatprep.subr.bf16.mxu0 %v2752_v13 }
 0x162   : > { %2755 = vmatpush3.bf16.msra.mxu0 %v2752_v13 }
 0x163   : > { %2757 = vmatprep.subr.bf16.mxu0 %v2756_v16 }
 0x166   : > { %2759 = vmatpush3.bf16.msra.mxu0 %v2756_v16 }
 0x167   : > { %2761 = vmatprep.subr.bf16.mxu0 %v2760_v19 }
 0x16a   : > { %2763 = vmatpush3.bf16.msra.mxu0 %v2760_v19 }
 0x16d   : > { %2566 = vmatmul.mubr.f32.vlgmr.msra.gmra.mrb[2].mxu0 %v3899_v20 }
 0x21e   : > { %v2532_v3 = vpop.f32.mrb[0].mxu1 }
 0x21f   : > { %v728_v4 = vpop.f32.mrb[1].mxu1 }
 0x220   : > { %v3881_v6 = vpop.f32.mrb[0].mxu0  ;;  %v2764_v8 = vpack.c.bf16 %v2532_v3, %v728_v4  ;;  %v3885_v10 = vpack.i.bf16 %v2532_v3, %v728_v4 }
 0x221   : > { %v3883_v9 = vpop.f32.mrb[1].mxu0 }
 0x222   : > { %1401 = vrot.lane.b32.xlu1 %v3883_v9, %s3422_s25  ;;  %2572 = vmatprep.mubr.msk.f32.mxu1 %vm828_vm0, %v3883_v9 }
 0x223   : > { %2766 = vmatprep.subr.msk.bf16.mxu1 %vm3877_vm1, %v2764_v8 }
 0x224   : > { %2769 = vmatpush3.bf16.xpose.msk.msra.mxu1 %vm3877_vm1, %v2764_v8 }
 0x22b   : > { %2573 = vmatmul.mubr.msk.f32.vlgmr.msra.gmra.mrb[2].mxu1 %vm828_vm0, %v3881_v6 }
 0x240   : > { %v2567_v27 = vpop.f32.mrb[2].mxu0 }
 0x241   : > { %v819_v28 = vpop.f32.mrb[3].mxu0 }
 0x242   : > { %v2770_v29 = vpack.c.bf16 %v2567_v27, %v819_v28  ;;  %v3913_v45 = vpack.i.bf16 %v2567_v27, %v819_v28 }
 0x244   : > { %2771 = vmatprep.subr.bf16.mxu0 %v2770_v29 }
 0x245   : > { %2773 = vmatpush3.bf16.msra.mxu0 %v2770_v29 }
 0x294   : > { %v1402_v46 = vpop.permute.xlu1 %1401 }
 0x2fe   : > { %v2574_v21 = vpop.f32.mrb[2].mxu1 }
 0x2ff   : > { %v907_v22 = vpop.f32.mrb[3].mxu1  ;;  %v917_v24 = vmul.f32 0.17677669, %v2574_v21 }
 0x300   : > { %v916_v23 = vmul.f32 0.17677669, %v907_v22 }
 0x301   : > { %v922_v26 = vsel %vm918_vm2, %v917_v24, -inf }
 0x302   : > { %v919_v25 = vsel %vm918_vm2, %v916_v23, -inf }
 0x303   : > { %920 = vmax.xlane.f32.xlu0 %v919_v25 }
 0x307   : > { %923 = vmax.xlane.f32.xlu0 %v922_v26 }
 0x31d   : > { %2972 = vrot.lane.b32.xlu0 %v3885_v10, %s3422_s25 }
 0x321   : > { %1028 = vrot.lane.b32.xlu0 %v3883_v9, %s3423_s23 }
 0x390   : > { %v921_v30 = vpop.xlane.xlu0 %920 }
 0x391   : > { %v925_v31 = vsub.f32 %v916_v23, %v921_v30 }
 0x393   : > { %v927_v34 = vmul.f32 1.442695, %v925_v31 }
 0x394   : > { %v924_v32 = vpop.xlane.xlu0 %923 }
 0x395   : > { %v926_v33 = vsub.f32 %v917_v24, %v924_v32 }
 0x397   : > { %v929_v35 = vmul.f32 1.442695, %v926_v33 }
 0x398   : > { %v2973_v36 = vpop.permute.xlu0 %2972 }
 0x399   : > { %3001 = vpow2.f32 %v929_v35  ;;  %v2975_v37 = vunpack.i.h.bf16 %v2973_v36  ;;  %v2974_v38 = vunpack.i.l.bf16 %v2973_v36 }
 0x39a   : > { %3003 = vpow2.f32 %v927_v34 }
 0x39b   : > { %v2800_v39 = vpack.c.bf16 %v2975_v37, %v2974_v38 }
 0x39c   : > { %v1029_v40 = vpop.permute.xlu0 %1028 }
 0x39d   : > { %2586 = vmatprep.mubr.msk.f32.mxu1 %vm828_vm0, %v1029_v40  ;;  %2802 = vmatprep.subr.msk.bf16.mxu0 %vm3877_vm1, %v2800_v39 }
 0x3a3   : > { %v3002_v41 = vpop.eup %3001 }
 0x3a4   : > { %v934_v42 = vsel %vm918_vm2, %v3002_v41, 0.0  ;;  %v3004_v43 = vpop.eup %3003 }
 0x3a5   : > { %935 = vadd.xlane.f32.xlu1 %v934_v42  ;;  %v931_v44 = vsel %vm918_vm2, %v3004_v43, 0.0 }
 0x3a9   : > { %932 = vadd.xlane.f32.xlu1 %v931_v44 }
 0x3ba   : > { %1403 = vrot.lane.b32.xlu1 %v3881_v6, %s3422_s25 }
 0x3be   : > { %2977 = vrot.lane.b32.xlu1 %v3885_v10, %s3423_s23 }
 0x3c2   : > { %1030 = vrot.lane.b32.xlu1 %v3881_v6, %s3423_s23 }
 0x432   : > { %v936_v47 = vpop.xlane.xlu1 %935 }
 0x433   : > { %3005 = vrcp.f32 %v936_v47 }
 0x436   : > { %v933_v48 = vpop.xlane.xlu1 %932 }
 0x437   : > { %3007 = vrcp.f32 %v933_v48 }
 0x43a   : > { %v1404_v49 = vpop.permute.xlu1 %1403 }
 0x43d   : > { %v3006_v50 = vpop.eup %3005 }
 0x43e   : > { %v940_v51 = vmul.f32 %v3006_v50, %v3002_v41  ;;  %v2978_v52 = vpop.permute.xlu1 %2977 }
 0x43f   : > { %v2980_v53 = vunpack.i.h.bf16 %v2978_v52  ;;  %v2979_v54 = vunpack.i.l.bf16 %v2978_v52 }
 0x440   : > { %942 = vst.msk [vmem:[%s3922_s19 + $0x8] sm:$0xff] %vm918_vm2, %v940_v51 }
 0x441   : > { %v3008_v55 = vpop.eup %3007  ;;  %v2774_v56 = vpack.c.bf16 %v2980_v53, %v2979_v54 }
 0x442   : > { %v938_v57 = vmul.f32 %v3008_v55, %v3004_v43  ;;  %v1031_v58 = vpop.permute.xlu1 %1030 }
 0x443   : > { %2776 = vmatprep.subr.msk.bf16.mxu1 %vm3877_vm1, %v2774_v56 }
 0x444   : > { %941 = vst.msk [vmem:[%s3922_s19] sm:$0xff] %vm918_vm2, %v938_v57  ;;  %2579 = vmatprep.mubr.msk.f32.mxu0 %vm918_vm2, %v938_v57  ;;  %2779 = vmatpush3.bf16.xpose.msk.msra.mxu1 %vm3877_vm1, %v2774_v56 }
 0x445   : > { %2580 = vmatmul.mubr.msk.f32.vlgmr.msra.gmra.mrb[4].mxu0 %vm918_vm2, %v940_v51 }
 0x446   : > { %2805 = vmatpush3.bf16.xpose.msk.msra.mxu0 %vm3877_vm1, %v2800_v39  ;;  %2622 = vmatprep.mubr.msk.f32.mxu0 %vm828_vm0, %v1402_v46 }
 0x44b   : > { %2587 = vmatmul.mubr.msk.f32.vlgmr.msra.gmra.mrb[4].mxu1 %vm828_vm0, %v1031_v58 }
 0x44d   : > { %2623 = vmatmul.mubr.msk.f32.vlgmr.msra.gmra.mrb[6].mxu0 %vm828_vm0, %v1404_v49 }
 0x518   : > { %v3939_v59 = vpop.f32.mrb[4].mxu0 }
 0x519   : > { %v3941_v60 = vpop.f32.mrb[5].mxu0 }
 0x51e   : > { %v2588_v62 = vpop.f32.mrb[4].mxu1 }
 0x51f   : > { %v1110_v63 = vpop.f32.mrb[5].mxu1  ;;  %v1120_v8 = vmul.f32 0.17677669, %v2588_v62 }
 0x520   : > { %v2624_v0 = vpop.f32.mrb[6].mxu0 }
 0x521   : > { %v1493_v1 = vmul.f32 0.17677669, %v2624_v0  ;;  %v1483_v2 = vpop.f32.mrb[7].mxu0  ;;  %v1124_v11 = vsel %vm918_vm2, %v1120_v8, -inf }
 0x522   : > { %v1492_v3 = vmul.f32 0.17677669, %v1483_v2 }
 0x523   : > { %v1497_v4 = vsel %vm918_vm2, %v1493_v1, -inf }
 0x524   : > { %1498 = vmax.xlane.f32.xlu1 %v1497_v4  ;;  %v1494_v7 = vsel %vm918_vm2, %v1492_v3, -inf }
 0x525   : > { %1495 = vmax.xlane.f32.xlu0 %v1494_v7  ;;  %v1235_v7 = vld [vmem:[#allocation13 + $0x20] sm:$0xff] }
 0x535   : > { %2987 = vrot.lane.b32.xlu1 %v3885_v10, %s3424_s30 }
 0x539   : > { %1693 = vrot.lane.b32.xlu1 %v3883_v9, %s3424_s30 }
 0x53d   : > { %1695 = vrot.lane.b32.xlu1 %v3881_v6, %s3424_s30  ;;  %v1119_v6 = vmul.f32 0.17677669, %v1110_v63 }
 0x53f   : > { %v1121_v21 = vsel %vm918_vm2, %v1119_v6, -inf }
 0x561   : > { %1125 = vmax.xlane.f32.xlu1 %v1124_v11  ;;  %v1237_v11 = vld [vmem:[#allocation13 + $0x30] sm:$0xff] }
 0x5b1   : > { %v1499_v12 = vpop.xlane.xlu1 %1498 }
 0x5b2   : > { %v1501_v13 = vsub.f32 %v1493_v1, %v1499_v12  ;;  %v1496_v14 = vpop.xlane.xlu0 %1495 }
 0x5b3   : > { %v1500_v15 = vsub.f32 %v1492_v3, %v1496_v14 }
 0x5b4   : > { %v1504_v16 = vmul.f32 1.442695, %v1501_v13  ;;  %v1238_v13 = vld [vmem:[#allocation13 + $0x38] sm:$0xff] }
 0x5b5   : > { %v1502_v17 = vmul.f32 1.442695, %v1500_v15  ;;  %v2988_v24 = vpop.permute.xlu1 %2987  ;;  %v2788_v14 = vpack.c.bf16 %v1238_v13, %v1237_v11  ;;  %v1024_v15 = vld [vmem:[#allocation13] sm:$0xff] }
 0x5b6   : > { %3009 = vpow2.f32 %v1504_v16  ;;  %v2990_v26 = vunpack.i.h.bf16 %v2988_v24  ;;  %v2989_v27 = vunpack.i.l.bf16 %v2988_v24  ;;  %v1025_v16 = vld [vmem:[#allocation13 + $0x8] sm:$0xff] }
 0x5b7   : > { %3011 = vpow2.f32 %v1502_v17  ;;  %v2792_v17 = vpack.c.bf16 %v1025_v16, %v1024_v15 }
 0x5b8   : > { %v2818_v33 = vpack.c.bf16 %v2990_v26, %v2989_v27  ;;  %v1026_v26 = vld [vmem:[#allocation13 + $0x10] sm:$0xff]  ;;  %v1027_v27 = vld [vmem:[#allocation13 + $0x18] sm:$0xff] }
 0x5b9   : > { %v1694_v36 = vpop.permute.xlu1 %1693 }
 0x5bd   : > { %v1696_v37 = vpop.permute.xlu1 %1695 }
 0x5c0   : > { %v3010_v18 = vpop.eup %3009 }
 0x5c1   : > { %v1509_v10 = vsel %vm918_vm2, %v3010_v18, 0.0  ;;  %v3012_v19 = vpop.eup %3011 }
 0x5c2   : > { %1510 = vadd.xlane.f32.xlu0 %v1509_v10  ;;  %v1506_v9 = vsel %vm918_vm2, %v3012_v19, 0.0 }
 0x5c6   : > { %1507 = vadd.xlane.f32.xlu0 %v1506_v9 }
 0x5dc   : > { %2982 = vrot.lane.b32.xlu0 %v3913_v45, %s3422_s25 }
 0x5ee   : > { %v1126_v38 = vpop.xlane.xlu1 %1125 }
 0x5ef   : > { %v1128_v39 = vsub.f32 %v1120_v8, %v1126_v38  ;;  %v1236_v8 = vld [vmem:[#allocation13 + $0x28] sm:$0xff]  ;;  %v1898_v38 = vld [vmem:[#allocation13 + $0x60] sm:$0xff] }
 0x5f0   : > { %v2784_v12 = vpack.c.bf16 %v1236_v8, %v1235_v7 }
 0x5f1   : > { %v1131_v42 = vmul.f32 1.442695, %v1128_v39  ;;  %v1899_v39 = vld [vmem:[#allocation13 + $0x68] sm:$0xff] }
 0x5fb   : > { %1122 = vmax.xlane.f32.xlu0 %v1121_v21 }
 0x64f   : > { %v1511_v22 = vpop.xlane.xlu0 %1510 }
 0x650   : > { %3013 = vrcp.f32 %v1511_v22 }
 0x653   : > { %v1508_v23 = vpop.xlane.xlu0 %1507 }
 0x654   : > { %3015 = vrcp.f32 %v1508_v23 }
 0x657   : > { %v2983_v25 = vpop.permute.xlu0 %2982 }
 0x658   : > { %v2985_v28 = vunpack.i.h.bf16 %v2983_v25  ;;  %v2984_v29 = vunpack.i.l.bf16 %v2983_v25 }
 0x65a   : > { %v3014_v30 = vpop.eup %3013  ;;  %v2806_v31 = vpack.c.bf16 %v2985_v28, %v2984_v29 }
 0x65b   : > { %v1515_v32 = vmul.f32 %v3014_v30, %v3010_v18  ;;  %v2796_v30 = vpack.c.bf16 %v1027_v27, %v1026_v26 }
 0x65c   : > { %2807 = vmatprep.subr.bf16.mxu0 %v2806_v31 }
 0x65d   : > { %2323 = vst.msk [vmem:[%s3922_s19 + $0x28] sm:$0xff] %vm918_vm2, %v1515_v32  ;;  %2809 = vmatpush3.bf16.msra.mxu0 %v2806_v31  ;;  %v1606_v31 = vld [vmem:[#allocation13 + $0x40] sm:$0xff] }
 0x65e   : > { %v3016_v34 = vpop.eup %3015  ;;  %2820 = vmatprep.subr.msk.bf16.mxu0 %vm3877_vm1, %v2818_v33 }
 0x65f   : > { %v1513_v35 = vmul.f32 %v3016_v34, %v3012_v19  ;;  %v1608_v34 = vld [vmem:[#allocation13 + $0x50] sm:$0xff] }
 0x661   : > { %2322 = vst.msk [vmem:[%s3922_s19 + $0x20] sm:$0xff] %vm918_vm2, %v1513_v35  ;;  %2629 = vmatprep.mubr.msk.f32.mxu0 %vm918_vm2, %v1513_v35  ;;  %v1609_v35 = vld [vmem:[#allocation13 + $0x58] sm:$0xff] }
 0x662   : > { %2630 = vmatmul.mubr.msk.f32.vlgmr.msra.gmra.mrb[8].mxu0 %vm918_vm2, %v1515_v32  ;;  %v1607_v32 = vld [vmem:[#allocation13 + $0x48] sm:$0xff] }
 0x663   : > { %2647 = vmatprep.mubr.msk.f32.mxu0 %vm828_vm0, %v1694_v36 }
 0x666   : > { %2823 = vmatpush3.bf16.xpose.msk.msra.mxu0 %vm3877_vm1, %v2818_v33  ;;  %v2810_v33 = vpack.c.bf16 %v1607_v32, %v1606_v31 }
 0x66d   : > { %2648 = vmatmul.mubr.msk.f32.vlgmr.msra.gmra.mrb[10].mxu0 %vm828_vm0, %v1696_v37 }
 0x688   : > { %v1123_v40 = vpop.xlane.xlu0 %1122 }
 0x689   : > { %v1127_v41 = vsub.f32 %v1119_v6, %v1123_v40 }
 0x68b   : > { %v1129_v43 = vmul.f32 1.442695, %v1127_v41 }
 0x68d   : > { %3017 = vpow2.f32 %v1129_v43  ;;  %v2828_v43 = vpack.c.bf16 %v1899_v39, %v1898_v38 }
 0x68e   : > { %3019 = vpow2.f32 %v1131_v42 }
 0x697   : > { %v3018_v44 = vpop.eup %3017 }
 0x698   : > { %v1133_v46 = vsel %vm918_vm2, %v3018_v44, 0.0  ;;  %v3020_v47 = vpop.eup %3019 }
 0x699   : > { %1134 = vadd.xlane.f32.xlu0 %v1133_v46  ;;  %v1136_v5 = vsel %vm918_vm2, %v3020_v47, 0.0  ;;  %v1900_v46 = vld [vmem:[#allocation13 + $0x70] sm:$0xff] }
 0x69d   : > { %1137 = vadd.xlane.f32.xlu0 %v1136_v5 }
 0x6b3   : > { %2992 = vrot.lane.b32.xlu0 %v3913_v45, %s3423_s23 }
 0x726   : > { %v1135_v48 = vpop.xlane.xlu0 %1134 }
 0x727   : > { %3021 = vrcp.f32 %v1135_v48 }
 0x72a   : > { %v1138_v49 = vpop.xlane.xlu0 %1137 }
 0x72b   : > { %3023 = vrcp.f32 %v1138_v49 }
 0x72e   : > { %v2993_v50 = vpop.permute.xlu0 %2992 }
 0x72f   : > { %v2995_v51 = vunpack.i.h.bf16 %v2993_v50  ;;  %v2994_v52 = vunpack.i.l.bf16 %v2993_v50 }
 0x731   : > { %v3022_v53 = vpop.eup %3021  ;;  %v2780_v54 = vpack.c.bf16 %v2995_v51, %v2994_v52 }
 0x732   : > { %v1140_v55 = vmul.f32 %v3022_v53, %v3018_v44 }
 0x733   : > { %2781 = vmatprep.subr.bf16.mxu1 %v2780_v54 }
 0x734   : > { %2783 = vmatpush3.bf16.msra.mxu1 %v2780_v54  ;;  %2310 = vst.msk [vmem:[%s3922_s19 + $0x10] sm:$0xff] %vm918_vm2, %v1140_v55  ;;  %2593 = vmatprep.mubr.msk.f32.mxu1 %vm918_vm2, %v1140_v55 }
 0x735   : > { %v3024_v56 = vpop.eup %3023  ;;  %v3976_v57 = vpop.f32.mrb[8].mxu0  ;;  %2785 = vmatprep.subr.bf16.mxu1 %v2784_v12 }
 0x736   : > { %v1142_v58 = vmul.f32 %v3024_v56, %v3020_v47  ;;  %v1597_v62 = vpop.f32.mrb[9].mxu0  ;;  %v1901_v47 = vld [vmem:[#allocation13 + $0x78] sm:$0xff] }
 0x737   : > { %v2832_v49 = vpack.c.bf16 %v1901_v47, %v1900_v46 }
 0x738   : > { %2311 = vst.msk [vmem:[%s3922_s19 + $0x18] sm:$0xff] %vm918_vm2, %v1142_v58  ;;  %2594 = vmatmul.mubr.msk.f32.vlgmr.msra.gmra.mrb[6].mxu1 %vm918_vm2, %v1142_v58 }
 0x739   : > { %2787 = vmatpush3.bf16.msra.mxu1 %v2784_v12 }
 0x73a   : > { %2789 = vmatprep.subr.bf16.mxu1 %v2788_v14 }
 0x73d   : > { %2791 = vmatpush3.bf16.msra.mxu1 %v2788_v14 }
 0x73e   : > { %2793 = vmatprep.subr.bf16.mxu1 %v2792_v17 }
 0x740   : > { %v2649_v63 = vpop.f32.mrb[10].mxu0 }
 0x741   : > { %v1775_v0 = vpop.f32.mrb[11].mxu0  ;;  %v1785_v2 = vmul.f32 0.17677669, %v2649_v63 }
 0x742   : > { %v1784_v1 = vmul.f32 0.17677669, %v1775_v0 }
 0x743   : > { %v1789_v4 = vsel %vm918_vm2, %v1785_v2, -inf }
 0x744   : > { %v1786_v3 = vsel %vm918_vm2, %v1784_v1, -inf }
 0x745   : > { %1787 = vmax.xlane.f32.xlu1 %v1786_v3 }
 0x749   : > { %1790 = vmax.xlane.f32.xlu1 %v1789_v4 }
 0x7d2   : > { %v1788_v18 = vpop.xlane.xlu1 %1787 }
 0x7d3   : > { %v1792_v10 = vsub.f32 %v1784_v1, %v1788_v18 }
 0x7d5   : > { %v1794_v6 = vmul.f32 1.442695, %v1792_v10 }
 0x7d6   : > { %v1791_v19 = vpop.xlane.xlu1 %1790 }
 0x7d7   : > { %v1793_v9 = vsub.f32 %v1785_v2, %v1791_v19 }
 0x7d9   : > { %v1796_v21 = vmul.f32 1.442695, %v1793_v9 }
 0x7db   : > { %3025 = vpow2.f32 %v1796_v21 }
 0x7dc   : > { %3027 = vpow2.f32 %v1794_v6 }
 0x7e5   : > { %v3026_v22 = vpop.eup %3025 }
 0x7e6   : > { %v1801_v23 = vsel %vm918_vm2, %v3026_v22, 0.0  ;;  %v3028_v24 = vpop.eup %3027 }
 0x7e7   : > { %1802 = vadd.xlane.f32.xlu1 %v1801_v23  ;;  %v1798_v25 = vsel %vm918_vm2, %v3028_v24, 0.0 }
 0x7eb   : > { %1799 = vadd.xlane.f32.xlu1 %v1798_v25 }
 0x7fc   : > { %2997 = vrot.lane.b32.xlu1 %v3913_v45, %s3424_s30  ;;  %v2814_v45 = vpack.c.bf16 %v1609_v35, %v1608_v34 }
 0x80b   : > { %v2595_v28 = vpop.f32.mrb[6].mxu1 }
 0x80c   : > { %v1226_v29 = vpop.f32.mrb[7].mxu1 }
 0x80d   : > { %2604 = vmatprep.mubr.msk.f32.mxu1 %vm828_vm0, %v1226_v29 }
 0x80e   : > { %2605 = vmatmul.mubr.msk.f32.vlgmr.msra.gmra.mrb[8].mxu1 %vm828_vm0, %v2595_v28 }
 0x80f   : > { %2795 = vmatpush3.bf16.msra.mxu1 %v2792_v17  ;;  %2615 = vmatprep.mubr.msk.f32.mxu1 %vm828_vm0, %v3941_v60 }
 0x810   : > { %2797 = vmatprep.subr.bf16.mxu1 %v2796_v30 }
 0x813   : > { %2799 = vmatpush3.bf16.msra.mxu1 %v2796_v30 }
 0x814   : > { %2811 = vmatprep.subr.bf16.mxu1 %v2810_v33 }
 0x816   : > { %2616 = vmatmul.mubr.msk.f32.vlgmr.msra.gmra.mrb[8].mxu1 %vm828_vm0, %v3939_v59 }
 0x817   : > { %2813 = vmatpush3.bf16.msra.mxu1 %v2810_v33  ;;  %2640 = vmatprep.mubr.msk.f32.mxu1 %vm828_vm0, %v1597_v62 }
 0x818   : > { %2815 = vmatprep.subr.bf16.mxu1 %v2814_v45 }
 0x81b   : > { %2817 = vmatpush3.bf16.msra.mxu1 %v2814_v45 }
 0x81e   : > { %2641 = vmatmul.mubr.msk.f32.vlgmr.msra.gmra.mrb[8].mxu1 %vm828_vm0, %v3976_v57 }
 0x874   : > { %v1803_v60 = vpop.xlane.xlu1 %1802 }
 0x875   : > { %3029 = vrcp.f32 %v1803_v60 }
 0x878   : > { %v1800_v36 = vpop.xlane.xlu1 %1799 }
 0x879   : > { %3031 = vrcp.f32 %v1800_v36 }
 0x87c   : > { %v2998_v37 = vpop.permute.xlu1 %2997 }
 0x87d   : > { %v3000_v40 = vunpack.i.h.bf16 %v2998_v37  ;;  %v2999_v41 = vunpack.i.l.bf16 %v2998_v37 }
 0x87f   : > { %v3030_v59 = vpop.eup %3029  ;;  %v2824_v42 = vpack.c.bf16 %v3000_v40, %v2999_v41 }
 0x880   : > { %v1807_v44 = vmul.f32 %v3030_v59, %v3026_v22 }
 0x881   : > { %2825 = vmatprep.subr.bf16.mxu1 %v2824_v42 }
 0x882   : > { %2333 = vst.msk [vmem:[%s3922_s19 + $0x38] sm:$0xff] %vm918_vm2, %v1807_v44  ;;  %2827 = vmatpush3.bf16.msra.mxu1 %v2824_v42 }
 0x883   : > { %v3032_v5 = vpop.eup %3031  ;;  %2829 = vmatprep.subr.bf16.mxu1 %v2828_v43 }
 0x884   : > { %v1805_v48 = vmul.f32 %v3032_v5, %v3028_v24 }
 0x886   : > { %2332 = vst.msk [vmem:[%s3922_s19 + $0x30] sm:$0xff] %vm918_vm2, %v1805_v48  ;;  %2654 = vmatprep.mubr.msk.f32.mxu1 %vm918_vm2, %v1805_v48 }
 0x887   : > { %2655 = vmatmul.mubr.msk.f32.vlgmr.msra.gmra.mrb[10].mxu1 %vm918_vm2, %v1807_v44 }
 0x888   : > { %2831 = vmatpush3.bf16.msra.mxu1 %v2828_v43 }
 0x889   : > { %2833 = vmatprep.subr.bf16.mxu1 %v2832_v49 }
 0x88c   : > { %2835 = vmatpush3.bf16.msra.mxu1 %v2832_v49 }
 0x95a   : > { %v2656_v50 = vpop.f32.mrb[10].mxu1 }
 0x95b   : > { %v1889_v51 = vpop.f32.mrb[11].mxu1 }
 0x95c   : > { %2665 = vmatprep.mubr.msk.f32.mxu1 %vm828_vm0, %v1889_v51 }
 0x95d   : > { %2666 = vmatmul.mubr.msk.f32.vlgmr.msra.gmra.mrb[8].mxu1 %vm828_vm0, %v2656_v50 }
 0xa30   : > { %v2667_v52 = vpop.f32.mrb[8].mxu1 }
 0xa31   : > { %v1986_v53 = vadd.f32 %v2667_v52, %v3899_v20  ;;  %v1974_v54 = vpop.f32.mrb[9].mxu1 }
 0xa32   : > { %v1985_v55 = vadd.f32 %v1974_v54, %v3872_v61 }
 0xa33   : > { %1989 = vadd.xlane.f32.xlu1 %v1986_v53 }
 0xa34   : > { %1987 = vadd.xlane.f32.xlu0 %v1985_v55 }
 0xac0   : > { %v1990_v56 = vpop.xlane.xlu1 %1989 }
 0xac1   : > { %v1988_v57 = vpop.xlane.xlu0 %1987  ;;  %v1993_v58 = vmul.f32 0.0078125, %v1990_v56 }
 0xac2   : > { %v1992_v62 = vmul.f32 0.0078125, %v1988_v57 }
 0xac3   : > { %v1995_v0 = vsub.f32 %v1986_v53, %v1993_v58 }
 0xac4   : > { %v1994_v63 = vsub.f32 %v1985_v55, %v1992_v62 }
 0xac5   : > { %v1997_v2 = vmul.f32 %v1995_v0, %v1995_v0 }
 0xac6   : > { %v1996_v1 = vmul.f32 %v1994_v63, %v1994_v63 }
 0xac8   : > { %1998 = vadd.xlane.f32.xlu0 %v1996_v1 }
 0xacc   : > { %2000 = vadd.xlane.f32.xlu0 %v1997_v2 }
 0xacd   : > { %3308 = shalt.err (!%p3305_p10)
}
 0xace   : > { %s3309_s20 = scalar_lea.hbm %s4011_s18, 1024  ;;  %s3313_s17 = scalar_lea.hbm %s4179_s9, 2048 }
 0xacf   : > { %p3310_p6 = scmp.ne.s32.totalorder %s4011_s18, %s3309_s20  ;;  %p3314_p9 = scmp.lt.u32.totalorder %s4011_s18, %s4179_s9 }
 0xad0   : > { %p3315_p11 = scmp.lt.u32.totalorder %s3313_s17, %s3309_s20  ;;  %p3317_p1 = scmp.lt.u32.totalorder %s3309_s20, %s4011_s18 }
 0xad1   : > { %p3311_p13 = pnand %p3310_p6, %p4180_p0 }
 0xad2   : > { %p3316_p3 = por %p3315_p11, %p3314_p9 }
 0xad3   : > { %p3312_p5 = pneg %p3311_p13 }
 0xad4   : > { %p3318_p8 = por %p3317_p1, %p3316_p3 }
 0xad6   : > { %p3319_p4 = pnand %p3318_p8, %p3312_p5 }
 0xad8   : > { %3322 = shalt.err (!%p3319_p4)
}
 0xad9   : > { %s3426_s27 = smov 128   ;;  %s3427_s19 = smov 8   ;;  %v2338_v12 = vld [vmem:[#allocation14] ss:$0 sm:$0xff]  ;;  %v2339_v14 = vld [vmem:[#allocation16] ss:$0 sm:$0xff] }
 0xada   : > { %2873 = dma.vmem_to_hbm [thread:$0]  (%p4180_p0), %s4013_s26, 1024, %s4011_s18, %s2036_s28, %s3426_s27, %s3426_s27, %s3427_s19  }
 0xadb   : > { %s2351_s30 = sshll.u32 %s4169_s3, 8  ;;  %s541_s16 = scalar_lea.vmem [#allocation17], %s3835_s13 }
 0xadc   : > { %s2049_s26 = sshll.u32 %s541_s16, 4  ;;  %s4181_s18 = sld [smem:[#allocation38_spill]]  ;;  %s4049_s26 = int_to_ptr.vmem [resolvable:$true] %s2049_s26 }
 0xadd   : > { %s2031_s1 = scalar_lea.sflag [#allocation4], %s3832_s7  ;;  %s3323_s24 = scalar_lea.vmem %s4049_s26, 256 }
 0xade   : > { %p3324_p7 = scmp.ne.s32.totalorder %s4049_s26, %s3323_s24  ;;  %s3428_s13 = smov [#allocation17]  }
 0xadf   : > { %s3327_s3 = sshll.u32 %s3428_s13, 4  ;;  %s3328_s3 = int_to_ptr.vmem [resolvable:$false] %s3327_s3 }
 0xae0   : > { %p3325_p12 = pnand %p3324_p7, %p4180_p0  ;;  %s3329_s10 = scalar_lea.vmem %s3328_s3, 512 }
 0xae1   : > { %p3330_p10 = scmp.lt.s32.totalorder %s4049_s26, %s3328_s3  ;;  %p3331_p6 = scmp.lt.s32.totalorder %s3329_s10, %s3323_s24 }
 0xae2   : > { %s4047_s28 = scalar_lea.hbm %s4181_s18, %s2351_s30  ;;  %p3326_p2 = pneg %p3325_p12 }
 0xae3   : > { %p3332_p13 = por %p3331_p6, %p3330_p10 }
 0xae5   : > { %p3333_p5 = pnand %p3332_p13, %p3326_p2 }
 0xb55   : > { %v1999_v61 = vpop.xlane.xlu0 %1998 }
 0xb56   : > { %v2002_v20 = vmul.f32 0.0078125, %v1999_v61 }
 0xb58   : > { %v2004_v3 = vadd.f32 1e-05, %v2002_v20 }
 0xb59   : > { %v2001_v4 = vpop.xlane.xlu0 %2000 }
 0xb5a   : > { %3033 = vrsqrt.f32 %v2004_v3  ;;  %v2003_v7 = vmul.f32 0.0078125, %v2001_v4 }
 0xb5c   : > { %v2005_v8 = vadd.f32 1e-05, %v2003_v7 }
 0xb5e   : > { %3035 = vrsqrt.f32 %v2005_v8 }
 0xb64   : > { %v3034_v11 = vpop.eup %3033 }
 0xb65   : > { %v2008_v13 = vmul.f32 %v3034_v11, %v1994_v63 }
 0xb67   : > { %v2017_v15 = vmul.f32 %v2338_v12, %v2008_v13 }
 0xb68   : > { %v3036_v16 = vpop.eup %3035 }
 0xb69   : > { %v2026_v17 = vadd.f32 %v2339_v14, %v2017_v15  ;;  %v2009_v18 = vmul.f32 %v3036_v16, %v1995_v0 }
 0xb6b   : > { %v2018_v10 = vmul.f32 %v2338_v12, %v2009_v18  ;;  %2028 = vst [vmem:[%s541_s16] sm:$0xff] %v2026_v17 }
 0xb6d   : > { %v2027_v19 = vadd.f32 %v2339_v14, %v2018_v10 }
 0xb6f   : > { %2029 = vst [vmem:[%s541_s16 + $0x8] sm:$0xff] %v2027_v19 }
 0xb70   : > { %3336 = shalt.err (!%p3333_p5)
}
 0xb71   : > { %s3337_s11 = scalar_lea.hbm %s4047_s28, 256  ;;  %s3341_s12 = scalar_lea.hbm %s4181_s18, 512 }
 0xb72   : > { %p3338_p9 = scmp.ne.s32.totalorder %s4047_s28, %s3337_s11  ;;  %p3342_p1 = scmp.lt.u32.totalorder %s4047_s28, %s4181_s18 }
 0xb73   : > { %p3343_p8 = scmp.lt.u32.totalorder %s3341_s12, %s3337_s11  ;;  %p3345_p7 = scmp.lt.u32.totalorder %s3337_s11, %s4047_s28 }
 0xb74   : > { %p3339_p11 = pnand %p3338_p9, %p4180_p0 }
 0xb75   : > { %p3344_p4 = por %p3343_p8, %p3342_p1 }
 0xb76   : > { %p3340_p3 = pneg %p3339_p11 }
 0xb77   : > { %p3346_p12 = por %p3345_p7, %p3344_p4 }
 0xb79   : > { %p3347_p2 = pnand %p3346_p12, %p3340_p3 }
 0xb7b   : > { %3350 = shalt.err (!%p3347_p2)
}
 0xb7c   : > { %2872 = dma.vmem_to_hbm [thread:$0]  (%p4180_p0), %s4049_s26, 256, %s4047_s28, %s2031_s1, %s3426_s27, %s3426_s27, %s3427_s19  }
 0xb7d PF: > { %s4182_s23 = sld [smem:[#allocation27_spill]]  ;;  %s4183_s30 = sld [smem:[#allocation33_spill]] }
 0xb7e   : > { %s4184_s16 = sld [smem:[#allocation28_spill]] }
 0xb83   : > { %s2080_s22 = sand.u32 1, %s4182_s23   ;;  %p4185_p10 = scmp.ne.s32.totalorder %s4183_s30, 0 }
 0xb84   : > { %p4186_p6 = scmp.ge.s32.totalorder %s4184_s16, 2  ;;  %s2081_s21 = scalar_lea.sflag [#allocation4], %s2080_s22 }
 0xb86   : > { %p2906_p13 = pnand %p4186_p6, %p4185_p10 }
 0xb88   : > { %3388 = dma.done.wait (!%p2906_p13), %s2081_s21, 256  }
 0xb89   : > { %3390 = vsyncadd (!%p2906_p13), %s2081_s21, 4294967040  ;;  %s2090_s29 = scalar_lea.sflag [#allocation19], %s2080_s22 }
 0xb8a   : > { %3392 = dma.done.wait (!%p2906_p13), %s2090_s29, 1024  }
 0xb8b   : > { %3394 = vsyncadd (!%p2906_p13), %s2090_s29, 4294966272  ;;  %s4187_s16 = sld [smem:[#allocation30_spill]]  ;;  %s4188_s7 = sld [smem:[#allocation31_spill]] }
 0xb8c   : > { %s4189_s13 = smov %s3401_s14  ;;  %s4190_s14 = smov %s3405_s15 }
 0xb91   : > { %p33_p0 = scmp.ge.s32.totalorder %s4187_s16, 4   ;;  %s4191_s15 = smov %s4188_s7 }
 0xb93   :  { %35 = sbr.rel (!%p33_p0) target bundleno = 19 (0x13), region = 169 }
 0xb9a   :  { %2095 = vsyncpa [#allocation3], 1 }
 0xb9b   :  { %2097 = vsyncpa [#allocation3 + $0x1], 1 }
 0xb9c   :  { %2098 = vsyncpa [#allocation6], 1 }
 0xb9d   :  { %2100 = vsyncpa [#allocation6 + $0x1], 1 }
 0xb9e   :  { %2101 = vsyncpa [#allocation9], 1 }
 0xb9f   :  { %2102 = vsyncpa [#allocation12], 1 }
 0xba0   :  { %2103 = vsyncpa [#allocation15], 1 }
 0xba1   :  { %2104 = vsyncpa [#allocation4], 1 }
 0xba2   :  { %2106 = vsyncpa [#allocation4 + $0x1], 1 }
 0xba3   :  { %2107 = vsyncpa [#allocation19], 1 }
 0xba4   :  { %2109 = vsyncpa [#allocation19 + $0x1], 1 }

</bundles_post_ra>
